<compile_context>
chip_gen: v6e
topology: v6e:2x2x1
jax: 0.10.0
libtpu: 0.0.40
codegen_flags: <defaults>
</compile_context>

<pallas_src>
from functools import partial
from typing import NamedTuple

import jax
import jax.numpy as jnp
from jax import lax
from jax.experimental import pallas as pl
from jax.experimental.pallas import tpu as pltpu

DIM_LAST_LAYER = 512
DIST_THRESHOLD = 0.02
PAIRWISE_EPS = 1e-6          # torch f.pairwise_distance default eps
NORMALIZE_EPS = 1e-12        # torch f.normalize default eps


# --------------------------------------------------------------------------------------
# Kernels
# --------------------------------------------------------------------------------------
def _embed_single_kernel(x_ref, w_ref, b_ref, e_ref):
    """Whole-K embedding matmul: no K grid, no accumulator.

    x_ref: (3*B_pad, K)  bf16   stacked [anchor; positive; negative]
    w_ref: (K, tn)       bf16   weight column slice (N split across TensorCores)
    b_ref: (1, tn)       f32
    e_ref: (3*B_pad, tn) f32    raw (un-normalized) embedding column slice
    """
    e_ref[...] = (
        jnp.dot(x_ref[...], w_ref[...], preferred_element_type=jnp.float32) + b_ref[...]
    )


def _embed_acc_kernel(x_ref, w_ref, b_ref, e_ref, acc_ref):
    """K-tiled embedding matmul with f32 VMEM accumulator; bias folded into the init."""
    k = pl.program_id(1)

    @pl.when(k == 0)
    def _():
        acc_ref[...] = jnp.broadcast_to(b_ref[...], acc_ref.shape)

    acc_ref[...] += jnp.dot(x_ref[...], w_ref[...], preferred_element_type=jnp.float32)

    @pl.when(k == pl.num_programs(1) - 1)
    def _():
        e_ref[...] = acc_ref[...]


def _epilogue_kernel(e_ref, outp_ref, outn_ref):
    """normalize + pairwise distances + threshold outputs (tiny follow-up micro-kernel).

    e_ref: (3*B_pad, D) f32 raw embeddings, rows [anchor | positive | negative] blocks,
           each block B_pad rows (sublane aligned).
    """
    e = e_ref[...]
    b_pad = e.shape[0] // 3
    B = outp_ref.shape[0]

    # f.normalize(p=2, dim=1): e / max(||e||, eps) == e * rsqrt(max(sumsq, eps^2))
    sumsq = jnp.sum(e * e, axis=1, keepdims=True)
    inv = lax.rsqrt(jnp.maximum(sumsq, jnp.float32(NORMALIZE_EPS * NORMALIZE_EPS)))
    e_n = e * inv

    ea = e_n[0:b_pad, :]              # anchor   (sublane-aligned start)
    ep = e_n[b_pad:2 * b_pad, :]      # positive
    eg = e_n[2 * b_pad:3 * b_pad, :]  # negative

    # f.pairwise_distance(x1, x2, p=2) = ||x1 - x2 + eps||_2 per row
    dist = jnp.sqrt(jnp.sum((ea - eg + PAIRWISE_EPS) ** 2, axis=1, keepdims=True))[:B]
    dstb = jnp.sqrt(jnp.sum((ea - ep + PAIRWISE_EPS) ** 2, axis=1, keepdims=True))[:B]

    col = lax.broadcasted_iota(jnp.int32, (B, 2), 1)

    # output_positive: col0 = 1 ; col1 = 0 if disturb < thr else 2
    outp_ref[...] = jnp.where(
        col == 0,
        jnp.float32(1.0),
        jnp.where(dstb < DIST_THRESHOLD, jnp.float32(0.0), jnp.float32(2.0)),
    )
    # output_negative: col1 = 1 ; col0 = 2 if distance < thr else 0
    outn_ref[...] = jnp.where(
        col == 1,
        jnp.float32(1.0),
        jnp.where(dist < DIST_THRESHOLD, jnp.float32(2.0), jnp.float32(0.0)),
    )


# --------------------------------------------------------------------------------------
# One-time parameter / tiling preparation (hoisted out of the per-call path)
# --------------------------------------------------------------------------------------
class _Config(NamedTuple):
    batch: int
    b_pad: int
    d_in: int
    d_emb: int
    k_pad: int
    tk: int
    n_k: int
    n_n: int
    tn: int
    vmem_limit: int


def _round_up(x, m):
    return ((x + m - 1) // m) * m


def _tpu_hw_info():
    """(vmem_capacity_bytes, tensorcores_per_chip) with conservative fallbacks."""
    vmem_cap = 64 << 20      # conservative fallback (v7x-sized) — safe on every generation
    n_tc = 1
    try:
        vmem_cap = int(pltpu.get_tpu_info().vmem_capacity_bytes)
    except Exception:
        pass
    try:
        kind = jax.devices()[0].device_kind.lower()
        # v7x has 2 TensorCores per chip; v4/v5p expose megacore the same way.
        if ("v7" in kind) or ("v4" in kind) or ("v5p" in kind):
            n_tc = 2
    except Exception:
        pass
    return vmem_cap, n_tc


def prepare_distance_net_params(w_emb, b_emb, batch_size):
    """One-time setup: cast/pad the embedding weight, pick generation-aware tiling."""
    d_in, d_emb = w_emb.shape
    vmem_cap, n_tc = _tpu_hw_info()

    # Generation-aware VMEM budget (headroom below physical per-TC capacity).
    budget = (48 << 20) if vmem_cap <= (64 << 20) else (100 << 20)
    headroom = 16 << 20

    b_pad = max(8, _round_up(batch_size, 8))   # sublane-aligned row groups (ideally 16 for bf16)
    rows = 3 * b_pad

    # Split the embedding columns across both TensorCores when the chip has two of them.
    n_n = 2 if (n_tc >= 2 and d_emb % 256 == 0) else 1
    tn = d_emb // n_n

    # VMEM sizing: f32 acc + double-buffered output slab + bias, then the biggest K tile
    # whose double-buffered bf16 (x, w) chunks still fit.
    fixed = rows * tn * 4 + 2 * rows * tn * 4 + 2 * tn * 4
    per_tk = 2 * (rows + tn) * 2                      # double-buffered bf16 x + w per K element
    tk_max = max(128, ((budget - headroom - fixed) // per_tk) // 128 * 128)

    k_aligned = _round_up(d_in, 128)
    if k_aligned <= tk_max:
        n_k, tk = 1, k_aligned                        # single shot: no K grid / accumulator
    else:
        n_k = -(-k_aligned // tk_max)
        tk = _round_up(-(-d_in // n_k), 128)
    k_pad = n_k * tk

    need = 2 * (rows * tk * 2 + tk * tn * 2 + tn * 4 + rows * tn * 4)
    if n_k > 1:
        need += rows * tn * 4                          # accumulator scratch
    vmem_limit = int(min(budget, need + headroom))

    # One-time weight/bias conversion (NOT per forward call): bf16 cast + zero K-padding.
    # Zero padding of the reduction dim does not change the matmul result.
    w_prep = jnp.pad(w_emb.astype(jnp.bfloat16), ((0, k_pad - d_in), (0, 0)))
    b_prep = b_emb.reshape(1, d_emb).astype(jnp.float32)

    cfg = _Config(batch_size, b_pad, d_in, d_emb, k_pad, tk, n_k, n_n, tn, vmem_limit)
    return w_prep, b_prep, cfg


# --------------------------------------------------------------------------------------
# Forward
# --------------------------------------------------------------------------------------
@partial(jax.jit, static_argnames=("cfg",))
def _forward_impl(anchor, positive, negative, w_prep, b_prep, cfg):
    B, b_pad, d_in, k_pad = cfg.batch, cfg.b_pad, cfg.d_in, cfg.k_pad
    tn, tk, n_n, n_k, d_emb = cfg.tn, cfg.tk, cfg.n_n, cfg.n_k, cfg.d_emb
    rows = 3 * b_pad

    # Per-call activation prep (small: 3*B_pad x d_in): stack triplet, pad rows to the
    # sublane-aligned group size and K to the padded weight K, cast to bf16.
    x = jnp.stack(
        [anchor.reshape(B, -1), positive.reshape(B, -1), negative.reshape(B, -1)], axis=0
    ).astype(jnp.bfloat16)                                           # (3, B, d_in)
    x = jnp.pad(x, ((0, 0), (0, b_pad - B), (0, k_pad - d_in)))
    x = x.reshape(rows, k_pad)                                       # (3*B_pad, k_pad)

    if n_k == 1:
        grid_spec = pltpu.PrefetchScalarGridSpec(
            num_scalar_prefetch=0,
            grid=(n_n,),
            in_specs=[
                pl.BlockSpec((rows, tk), lambda n: (0, 0)),          # whole stacked LHS
                pl.BlockSpec((tk, tn), lambda n: (0, n)),            # weight column half
                pl.BlockSpec((1, tn), lambda n: (0, n)),             # bias column half
            ],
            out_specs=pl.BlockSpec((rows, tn), lambda n: (0, n)),
        )
        kernel = _embed_single_kernel
        dims = ("parallel",)
    else:
        grid_spec = pltpu.PrefetchScalarGridSpec(
            num_scalar_prefetch=0,
            grid=(n_n, n_k),                                         # K (reduction) last
            in_specs=[
                pl.BlockSpec((rows, tk), lambda n, k: (0, k)),
                pl.BlockSpec((tk, tn), lambda n, k: (k, n)),
                pl.BlockSpec((1, tn), lambda n, k: (0, n)),
            ],
            out_specs=pl.BlockSpec((rows, tn), lambda n, k: (0, n)),
            scratch_shapes=[pltpu.VMEM((rows, tn), jnp.float32)],
        )
        kernel = _embed_acc_kernel
        dims = ("parallel", "arbitrary")

    e = pl.pallas_call(
        kernel,
        grid_spec=grid_spec,
        out_shape=jax.ShapeDtypeStruct((rows, d_emb), jnp.float32),
        compiler_params=pltpu.CompilerParams(
            dimension_semantics=dims,
            vmem_limit_bytes=cfg.vmem_limit,
        ),
    )(x, w_prep, b_prep)

    # Tiny epilogue micro-kernel: normalize + distances + threshold outputs.
    out_pos, out_neg = pl.pallas_call(
        _epilogue_kernel,
        grid_spec=pltpu.PrefetchScalarGridSpec(
            num_scalar_prefetch=0,
            grid=(1,),
            in_specs=[pl.BlockSpec((rows, d_emb), lambda i: (0, 0))],
            out_specs=[
                pl.BlockSpec((B, 2), lambda i: (0, 0)),
                pl.BlockSpec((B, 2), lambda i: (0, 0)),
            ],
        ),
        out_shape=(
            jax.ShapeDtypeStruct((B, 2), jnp.float32),
            jax.ShapeDtypeStruct((B, 2), jnp.float32),
        ),
    )(e)

    # PyTorch allocates the outputs as float64; values are exactly {0,1,2}, so f32 is
    # value-exact. Only cast if the surrounding program already enables x64.
    if jax.config.jax_enable_x64:
        return out_pos.astype(jnp.float64), out_neg.astype(jnp.float64)
    return out_pos, out_neg


def distance_based_net_forward(data, w_prep, b_prep, cfg):
    """data = [anchor, positive, negative], each NCHW (B, C, H, W)."""
    anchor, positive, negative = data
    return _forward_impl(anchor, positive, negative, w_prep, b_prep, cfg)


# --------------------------------------------------------------------------------------
# Pure-JAX reference (bf16 matmul like the kernel, f32 elsewhere)
# --------------------------------------------------------------------------------------
def _reference_forward(data, w_emb, b_emb):
    anchor, positive, negative = data
    B = anchor.shape[0]

    def embed(xx):
        xx = xx.reshape(B, -1).astype(jnp.bfloat16)
        e = jnp.dot(xx, w_emb.astype(jnp.bfloat16),
                    preferred_element_type=jnp.float32) + b_emb.astype(jnp.float32)
        nrm = jnp.sqrt(jnp.sum(e * e, axis=1, keepdims=True))
        return e / jnp.maximum(nrm, NORMALIZE_EPS)

    ea, ep, en = embed(anchor), embed(positive), embed(negative)
    dist = jnp.sqrt(jnp.sum((ea - en + PAIRWISE_EPS) ** 2, axis=1))
    dstb = jnp.sqrt(jnp.sum((ea - ep + PAIRWISE_EPS) ** 2, axis=1))
    out_pos = jnp.stack([jnp.ones_like(dstb),
                         jnp.where(dstb < DIST_THRESHOLD, 0.0, 2.0)], axis=1)
    out_neg = jnp.stack([jnp.where(dist < DIST_THRESHOLD, 2.0, 0.0),
                         jnp.ones_like(dist)], axis=1)
    return out_pos.astype(jnp.float32), out_neg.astype(jnp.float32)


if __name__ == "__main__":
    key = jax.random.PRNGKey(0)
    k_a, k_p, k_n, k_w, k_b, k_fw, k_fb = jax.random.split(key, 7)

    # Small NCHW inputs consistent with an image-embedding forward pass.
    B, C, H, W = 2, 4, 16, 16
    anchor = jax.random.normal(k_a, (B, C, H, W), dtype=jnp.float32)
    positive = jax.random.normal(k_p, (B, C, H, W), dtype=jnp.float32)
    negative = jax.random.normal(k_n, (B, C, H, W), dtype=jnp.float32)

    d_in = C * H * W                      # 1024
    d_emb = DIM_LAST_LAYER                # 512

    # Deterministic synthetic parameters (embedding-net stand-in).
    w_emb = jax.random.normal(k_w, (d_in, d_emb), dtype=jnp.float32) * (1.0 / (d_in ** 0.5))
    b_emb = jax.random.normal(k_b, (d_emb,), dtype=jnp.float32) * 0.01

    # final_layer = nn.Linear(512, 512): initialized per __init__ but unused in forward
    # (WITH_DIST_WEIGHT = False).
    w_final = jax.random.normal(k_fw, (d_emb, d_emb), dtype=jnp.float32) * (1.0 / (d_emb ** 0.5))
    b_final = jax.random.normal(k_fb, (d_emb,), dtype=jnp.float32) * 0.01
    del w_final, b_final

    # One-time parameter preparation (weight cast/pad + tiling decisions hoisted here).
    w_prep, b_prep, cfg = prepare_distance_net_params(w_emb, b_emb, B)

    data = [anchor, positive, negative]
    out_pos, out_neg = distance_based_net_forward(data, w_prep, b_prep, cfg)
    jax.block_until_ready((out_pos, out_neg))

    assert out_pos.shape == (B, 2) and out_neg.shape == (B, 2)

    # Correctness check (distances here are ~sqrt(2) >> 0.02, so thresholds are robust).
    ref_pos, ref_neg = _reference_forward(data, w_emb, b_emb)
    assert bool(jnp.all(out_pos.astype(jnp.float32) == ref_pos))
    assert bool(jnp.all(out_neg.astype(jnp.float32) == ref_neg))

    print("KERNEL_OK")
</pallas_src>

<mosaic_0001>
module attributes {stable_mosaic.version = 11 : i64} {
  func.func @_epilogue_kernel(%arg0: i32, %arg1: memref<24x512xf32, #tpu.memory_space<vmem>>, %arg2: memref<2x2xf32, #tpu.memory_space<vmem>>, %arg3: memref<2x2xf32, #tpu.memory_space<vmem>>) attributes {dimension_semantics = [#tpu.dimension_semantics<arbitrary>], iteration_bounds = array<i64: 1>, scalar_prefetch = 0 : i64, scratch_operands = 0 : i64, tpu.core_type = #tpu.core_type<tc>, window_params = [{pipeline_mode = #tpu.pipeline_mode<synchronous>, transform_indices = @transform_0, window_bounds = array<i64: 24, 512>}, {pipeline_mode = #tpu.pipeline_mode<synchronous>, transform_indices = @transform_1, window_bounds = array<i64: 2, 2>}, {pipeline_mode = #tpu.pipeline_mode<synchronous>, transform_indices = @transform_2, window_bounds = array<i64: 2, 2>}]} {
    %c0 = arith.constant 0 : index
    %c0_0 = arith.constant 0 : index
    %0 = vector.load %arg1[%c0, %c0_0] : memref<24x512xf32, #tpu.memory_space<vmem>>, vector<24x512xf32>
    %1 = arith.mulf %0, %0 : vector<24x512xf32>
    %cst = arith.constant dense<0.000000e+00> : vector<24xf32>
    %2 = vector.multi_reduction <add>, %1, %cst [1] : vector<24x512xf32> to vector<24xf32>
    %3 = vector.shape_cast %2 : vector<24xf32> to vector<24x1xf32>
    %cst_1 = arith.constant 1.000000e-24 : f32
    %4 = vector.broadcast %cst_1 : f32 to vector<24x1xf32>
    %5 = arith.maximumf %3, %4 : vector<24x1xf32>
    %6 = math.rsqrt %5 : vector<24x1xf32>
    %7 = vector.broadcast %6 : vector<24x1xf32> to vector<24x512xf32>
    %8 = arith.mulf %0, %7 : vector<24x512xf32>
    %9 = vector.extract_strided_slice %8 {offsets = [0, 0], sizes = [8, 512], strides = [1, 1]} : vector<24x512xf32> to vector<8x512xf32>
    %10 = vector.extract_strided_slice %8 {offsets = [8, 0], sizes = [8, 512], strides = [1, 1]} : vector<24x512xf32> to vector<8x512xf32>
    %11 = vector.extract_strided_slice %8 {offsets = [16, 0], sizes = [8, 512], strides = [1, 1]} : vector<24x512xf32> to vector<8x512xf32>
    %12 = arith.subf %9, %11 : vector<8x512xf32>
    %cst_2 = arith.constant 9.99999997E-7 : f32
    %13 = vector.broadcast %cst_2 : f32 to vector<8x512xf32>
    %14 = arith.addf %12, %13 : vector<8x512xf32>
    %15 = arith.mulf %14, %14 : vector<8x512xf32>
    %cst_3 = arith.constant dense<0.000000e+00> : vector<8xf32>
    %16 = vector.multi_reduction <add>, %15, %cst_3 [1] : vector<8x512xf32> to vector<8xf32>
    %17 = vector.shape_cast %16 : vector<8xf32> to vector<8x1xf32>
    %18 = math.sqrt %17 : vector<8x1xf32>
    %19 = vector.extract_strided_slice %18 {offsets = [0, 0], sizes = [2, 1], strides = [1, 1]} : vector<8x1xf32> to vector<2x1xf32>
    %20 = arith.subf %9, %10 : vector<8x512xf32>
    %cst_4 = arith.constant 9.99999997E-7 : f32
    %21 = vector.broadcast %cst_4 : f32 to vector<8x512xf32>
    %22 = arith.addf %20, %21 : vector<8x512xf32>
    %23 = arith.mulf %22, %22 : vector<8x512xf32>
    %cst_5 = arith.constant dense<0.000000e+00> : vector<8xf32>
    %24 = vector.multi_reduction <add>, %23, %cst_5 [1] : vector<8x512xf32> to vector<8xf32>
    %25 = vector.shape_cast %24 : vector<8xf32> to vector<8x1xf32>
    %26 = math.sqrt %25 : vector<8x1xf32>
    %27 = vector.extract_strided_slice %26 {offsets = [0, 0], sizes = [2, 1], strides = [1, 1]} : vector<8x1xf32> to vector<2x1xf32>
    %28 = tpu.iota {dimensions = array<i32: 1>} : vector<2x2xi32>
    %c0_i32 = arith.constant 0 : i32
    %29 = vector.broadcast %c0_i32 : i32 to vector<2x2xi32>
    %30 = arith.cmpi eq, %28, %29 : vector<2x2xi32>
    %cst_6 = arith.constant 2.000000e-02 : f32
    %31 = vector.broadcast %cst_6 : f32 to vector<2x1xf32>
    %32 = arith.cmpf olt, %27, %31 : vector<2x1xf32>
    %cst_7 = arith.constant 0.000000e+00 : f32
    %cst_8 = arith.constant 2.000000e+00 : f32
    %33 = vector.broadcast %cst_7 : f32 to vector<2x1xf32>
    %34 = vector.broadcast %cst_8 : f32 to vector<2x1xf32>
    %35 = arith.select %32, %33, %34 : vector<2x1xi1>, vector<2x1xf32>
    %cst_9 = arith.constant 1.000000e+00 : f32
    %36 = vector.broadcast %cst_9 : f32 to vector<2x2xf32>
    %37 = vector.shape_cast %35 : vector<2x1xf32> to vector<2x1xf32>
    %38 = vector.broadcast %37 : vector<2x1xf32> to vector<2x2xf32>
    %39 = arith.select %30, %36, %38 : vector<2x2xi1>, vector<2x2xf32>
    %c0_10 = arith.constant 0 : index
    %c0_11 = arith.constant 0 : index
    %40 = vector.load %arg2[%c0_10, %c0_11] : memref<2x2xf32, #tpu.memory_space<vmem>>, vector<2x2xf32>
    tpu.vector_store %arg2[%c0_10, %c0_11], %39 {strides = array<i32>} : memref<2x2xf32, #tpu.memory_space<vmem>>, vector<2x2xf32>,
    %c1_i32 = arith.constant 1 : i32
    %41 = vector.broadcast %c1_i32 : i32 to vector<2x2xi32>
    %42 = arith.cmpi eq, %28, %41 : vector<2x2xi32>
    %cst_12 = arith.constant 2.000000e-02 : f32
    %43 = vector.broadcast %cst_12 : f32 to vector<2x1xf32>
    %44 = arith.cmpf olt, %19, %43 : vector<2x1xf32>
    %cst_13 = arith.constant 2.000000e+00 : f32
    %cst_14 = arith.constant 0.000000e+00 : f32
    %45 = vector.broadcast %cst_13 : f32 to vector<2x1xf32>
    %46 = vector.broadcast %cst_14 : f32 to vector<2x1xf32>
    %47 = arith.select %44, %45, %46 : vector<2x1xi1>, vector<2x1xf32>
    %cst_15 = arith.constant 1.000000e+00 : f32
    %48 = vector.broadcast %cst_15 : f32 to vector<2x2xf32>
    %49 = vector.shape_cast %47 : vector<2x1xf32> to vector<2x1xf32>
    %50 = vector.broadcast %49 : vector<2x1xf32> to vector<2x2xf32>
    %51 = arith.select %42, %48, %50 : vector<2x2xi1>, vector<2x2xf32>
    %c0_16 = arith.constant 0 : index
    %c0_17 = arith.constant 0 : index
    %52 = vector.load %arg3[%c0_16, %c0_17] : memref<2x2xf32, #tpu.memory_space<vmem>>, vector<2x2xf32>
    tpu.vector_store %arg3[%c0_16, %c0_17], %51 {strides = array<i32>} : memref<2x2xf32, #tpu.memory_space<vmem>>, vector<2x2xf32>,
    return
  }
  func.func @transform_0(%arg0: i32) -> (i32, i32) {
    %c0_i32 = arith.constant 0 : i32
    %c0_i32_0 = arith.constant 0 : i32
    %c0_i32_1 = arith.constant 0 : i32
    return %c0_i32, %c0_i32_0 : i32, i32
  }
  func.func @transform_1(%arg0: i32) -> (i32, i32) {
    %c0_i32 = arith.constant 0 : i32
    %c0_i32_0 = arith.constant 0 : i32
    %c0_i32_1 = arith.constant 0 : i32
    return %c0_i32, %c0_i32_0 : i32, i32
  }
  func.func @transform_2(%arg0: i32) -> (i32, i32) {
    %c0_i32 = arith.constant 0 : i32
    %c0_i32_0 = arith.constant 0 : i32
    %c0_i32_1 = arith.constant 0 : i32
    return %c0_i32, %c0_i32_0 : i32, i32
  }
}

module attributes {stable_mosaic.version = 11 : i64} {
  func.func @_embed_single_kernel(%arg0: i32, %arg1: memref<24x1024xbf16, #tpu.memory_space<vmem>>, %arg2: memref<1024x512xbf16, #tpu.memory_space<vmem>>, %arg3: memref<1x512xf32, #tpu.memory_space<vmem>>, %arg4: memref<24x512xf32, #tpu.memory_space<vmem>>) attributes {dimension_semantics = [#tpu.dimension_semantics<parallel>], iteration_bounds = array<i64: 1>, scalar_prefetch = 0 : i64, scratch_operands = 0 : i64, tpu.core_type = #tpu.core_type<tc>, window_params = [{pipeline_mode = #tpu.pipeline_mode<synchronous>, transform_indices = @transform_0, window_bounds = array<i64: 24, 1024>}, {transform_indices = @transform_1, window_bounds = array<i64: 1024, 512>}, {transform_indices = @transform_2, window_bounds = array<i64: 1, 512>}, {transform_indices = @transform_3, window_bounds = array<i64: 24, 512>}]} {
    %c0 = arith.constant 0 : index
    %c0_0 = arith.constant 0 : index
    %0 = vector.load %arg1[%c0, %c0_0] : memref<24x1024xbf16, #tpu.memory_space<vmem>>, vector<24x1024xbf16>
    %c0_1 = arith.constant 0 : index
    %c0_2 = arith.constant 0 : index
    %1 = vector.load %arg2[%c0_1, %c0_2] : memref<1024x512xbf16, #tpu.memory_space<vmem>>, vector<1024x512xbf16>
    %cst = arith.constant dense<0.000000e+00> : vector<24x512xf32>
    %2 = tpu.matmul %0, %1, %cst {dimension_numbers = #tpu.dot_dimension_numbers<[1], [0], [0], [1], [0, 0, 1, 1], [], []>} : vector<24x1024xbf16>, vector<1024x512xbf16>, vector<24x512xf32> -> vector<24x512xf32>
    %c0_3 = arith.constant 0 : index
    %c0_4 = arith.constant 0 : index
    %3 = vector.load %arg3[%c0_3, %c0_4] : memref<1x512xf32, #tpu.memory_space<vmem>>, vector<1x512xf32>
    %4 = vector.broadcast %3 : vector<1x512xf32> to vector<24x512xf32>
    %5 = arith.addf %2, %4 : vector<24x512xf32>
    %c0_5 = arith.constant 0 : index
    %c0_6 = arith.constant 0 : index
    %6 = vector.load %arg4[%c0_5, %c0_6] : memref<24x512xf32, #tpu.memory_space<vmem>>, vector<24x512xf32>
    tpu.vector_store %arg4[%c0_5, %c0_6], %5 {strides = array<i32>} : memref<24x512xf32, #tpu.memory_space<vmem>>, vector<24x512xf32>,
    return
  }
  func.func @transform_0(%arg0: i32) -> (i32, i32) {
    %c0_i32 = arith.constant 0 : i32
    %c0_i32_0 = arith.constant 0 : i32
    %c0_i32_1 = arith.constant 0 : i32
    return %c0_i32, %c0_i32_0 : i32, i32
  }
  func.func @transform_1(%arg0: i32) -> (i32, i32) {
    %c0_i32 = arith.constant 0 : i32
    %c0_i32_0 = arith.constant 0 : i32
    return %c0_i32, %arg0 : i32, i32
  }
  func.func @transform_2(%arg0: i32) -> (i32, i32) {
    %c0_i32 = arith.constant 0 : i32
    %c0_i32_0 = arith.constant 0 : i32
    return %c0_i32, %arg0 : i32, i32
  }
  func.func @transform_3(%arg0: i32) -> (i32, i32) {
    %c0_i32 = arith.constant 0 : i32
    %c0_i32_0 = arith.constant 0 : i32
    return %c0_i32, %arg0 : i32, i32
  }
}

</mosaic_0001>

<bundles_post_ra>
// kernel: _forward_impl.3
= control target key start
LH: loop header
LB: loop body
LE: loop exit
PB: predicated region body
PF: predicated region fallthrough
CT: control target
= control target key end

     0   :  { %8 = vsyncpa [#allocation3], 0  ;;  %s279_s0 = inlined_call_operand.vmem [shape: f32[24,512], index: 0, kind: input, shape index: {}]   ;;  %s280_s1 = inlined_call_operand.hbm [shape: f32[2,2], index: 1, kind: output, shape index: {0}]   ;;  %s281_s2 = inlined_call_operand.hbm [shape: f32[2,2], index: 2, kind: output, shape index: {1}]  }
   0x1   :  { %v20_v0 = vld [vmem:[%s279_s0 + $0x40] sm:$0xff]  ;;  %v21_v1 = vld [vmem:[%s279_s0 + $0x48] sm:$0xff]  ;;  %v22_v2 = vld [vmem:[%s279_s0 + $0x50] sm:$0xff] }
   0x2   :  { %v23_v3 = vld [vmem:[%s279_s0 + $0x58] sm:$0xff]  ;;  %v32_v4 = vmul.f32 %v20_v0, %v20_v0  ;;  %v33_v5 = vmul.f32 %v21_v1, %v21_v1  ;;  %v34_v6 = vmul.f32 %v22_v2, %v22_v2  ;;  %v12_v7 = vld [vmem:[%s279_s0] sm:$0xff]  ;;  %v13_v8 = vld [vmem:[%s279_s0 + $0x8] sm:$0xff] }
   0x3   :  { %v14_v9 = vld [vmem:[%s279_s0 + $0x10] sm:$0xff]  ;;  %v15_v10 = vld [vmem:[%s279_s0 + $0x18] sm:$0xff]  ;;  %v24_v11 = vmul.f32 %v12_v7, %v12_v7  ;;  %v25_v12 = vmul.f32 %v13_v8, %v13_v8  ;;  %v16_v13 = vld [vmem:[%s279_s0 + $0x20] sm:$0xff]  ;;  %v35_v14 = vmul.f32 %v23_v3, %v23_v3 }
   0x4   :  { %v46_v15 = vadd.f32 %v33_v5, %v32_v4  ;;  %v26_v16 = vmul.f32 %v14_v9, %v14_v9  ;;  %v17_v17 = vld [vmem:[%s279_s0 + $0x28] sm:$0xff]  ;;  %v18_v18 = vld [vmem:[%s279_s0 + $0x30] sm:$0xff]  ;;  %v19_v19 = vld [vmem:[%s279_s0 + $0x38] sm:$0xff]  ;;  %v28_v20 = vmul.f32 %v16_v13, %v16_v13  ;;  %v27_v21 = vmul.f32 %v15_v10, %v15_v10 }
   0x5   :  { %v36_v22 = vadd.f32 %v25_v12, %v24_v11  ;;  %v29_v23 = vmul.f32 %v17_v17, %v17_v17  ;;  %v30_v24 = vmul.f32 %v18_v18, %v18_v18 }
   0x6   :  { %9 = vsyncpa [#allocation5], 0  ;;  %v47_v25 = vadd.f32 %v46_v15, %v34_v6  ;;  %v31_v27 = vmul.f32 %v19_v19, %v19_v19  ;;  %s216_s0 = smov [#allocation4]   ;;  %vm123_vm3 = vcmask 9216   ;;  %s218_s6 = smov [#allocation2]  }
   0x7   :  { %v37_v26 = vadd.f32 %v36_v22, %v26_v16  ;;  %v41_v28 = vadd.f32 %v29_v23, %v28_v20  ;;  %v117_v22 = vlaneseq  ;;  %s146_s5 = sshll.u32 %s216_s0, 4  ;;  %s136_s7 = sshll.u32 %s218_s6, 4  ;;  %s147_s5 = int_to_ptr.vmem [resolvable:$true] %s146_s5  ;;  %s137_s7 = int_to_ptr.vmem [resolvable:$true] %s136_s7 }
   0x8   :  { %v48_v29 = vadd.f32 %v47_v25, %v35_v14  ;;  %s172_s8 = scalar_lea.vmem %s147_s5, 32  ;;  %p177_p1 = scmp.lt.s32.totalorder %s147_s5, %s147_s5 }
   0x9   :  { %v38_v30 = vadd.f32 %v37_v26, %v27_v21  ;;  %v42_v31 = vadd.f32 %v41_v28, %v30_v24  ;;  %v118_v24 = vand.u32 127, %v117_v22  ;;  %p173_p0 = scmp.ne.s32.totalorder %s147_s5, %s172_s8  ;;  %p178_p2 = scmp.lt.s32.totalorder %s172_s8, %s172_s8 }
   0xa   :  { %49 = vadd.xlane.f32.xlu1 %v48_v29 }
   0xb   :  { %39 = vadd.xlane.f32.xlu0 %v38_v30  ;;  %v43_v32 = vadd.f32 %v42_v31, %v31_v27  ;;  %vm125_vm2 = vcmp.eq.s32.totalorder %v118_v24, 1  ;;  %v217_v31 = vmov 0.0   ;;  %vm119_vm7 = vcmp.eq.s32.totalorder %v118_v24, 0  ;;  %p179_p3 = por %p178_p2, %p177_p1 }
   0xd   :  { %p180_p4 = pnand %p179_p3, %p173_p0 }
   0xf   :  { %44 = vadd.xlane.f32.xlu0 %v43_v32 }
  0x93   :  { %v50_v33 = vpop.xlane.xlu1 %49 }
  0x94   :  { %v53_v34 = vmax.f32 %v50_v33, 1e-24  ;;  %v40_v35 = vpop.xlane.xlu0 %39 }
  0x95   :  { %v51_v36 = vmax.f32 %v40_v35, 1e-24 }
  0x96   :  { %162 = vrsqrt.f32 %v53_v34 }
  0x97   :  { %164 = vrsqrt.f32 %v51_v36 }
  0x98   :  { %v45_v37 = vpop.xlane.xlu0 %44 }
  0x99   :  { %v52_v38 = vmax.f32 %v45_v37, 1e-24 }
  0x9b   :  { %166 = vrsqrt.f32 %v52_v38 }
  0xa3   :  { %v163_v39 = vpop.eup %162 }
  0xa4   :  { %v165_v40 = vpop.eup %164  ;;  %v65_v41 = vmul.f32 %v163_v39, %v20_v0  ;;  %v66_v42 = vmul.f32 %v163_v39, %v21_v1  ;;  %v67_v43 = vmul.f32 %v163_v39, %v22_v2  ;;  %v68_v44 = vmul.f32 %v163_v39, %v23_v3 }
  0xa5   :  { %v57_v45 = vmul.f32 %v165_v40, %v12_v7  ;;  %v58_v46 = vmul.f32 %v165_v40, %v13_v8  ;;  %v59_v47 = vmul.f32 %v165_v40, %v14_v9  ;;  %v60_v48 = vmul.f32 %v165_v40, %v15_v10 }
  0xa7   :  { %v69_v49 = vsub.f32 %v57_v45, %v65_v41  ;;  %v70_v50 = vsub.f32 %v58_v46, %v66_v42  ;;  %v71_v51 = vsub.f32 %v59_v47, %v67_v43  ;;  %v72_v52 = vsub.f32 %v60_v48, %v68_v44 }
  0xa8   :  { %v167_v53 = vpop.eup %166 }
  0xa9   :  { %v73_v54 = vadd.f32 1e-06, %v69_v49  ;;  %v74_v55 = vadd.f32 1e-06, %v70_v50  ;;  %v75_v56 = vadd.f32 1e-06, %v71_v51  ;;  %v61_v57 = vmul.f32 %v167_v53, %v16_v13 }
  0xaa   :  { %v62_v58 = vmul.f32 %v167_v53, %v17_v17  ;;  %v63_v59 = vmul.f32 %v167_v53, %v18_v18  ;;  %v64_v60 = vmul.f32 %v167_v53, %v19_v19  ;;  %v76_v61 = vadd.f32 1e-06, %v72_v52 }
  0xab   :  { %v77_v62 = vmul.f32 %v73_v54, %v73_v54  ;;  %v78_v63 = vmul.f32 %v74_v55, %v74_v55  ;;  %v93_v0 = vsub.f32 %v57_v45, %v61_v57  ;;  %v79_v4 = vmul.f32 %v75_v56, %v75_v56 }
  0xac   :  { %v94_v1 = vsub.f32 %v58_v46, %v62_v58  ;;  %v95_v2 = vsub.f32 %v59_v47, %v63_v59  ;;  %v96_v3 = vsub.f32 %v60_v48, %v64_v60  ;;  %v80_v9 = vmul.f32 %v76_v61, %v76_v61 }
  0xad   :  { %v81_v5 = vadd.f32 %v78_v63, %v77_v62  ;;  %v97_v6 = vadd.f32 1e-06, %v93_v0 }
  0xae   :  { %v98_v7 = vadd.f32 1e-06, %v94_v1  ;;  %v99_v8 = vadd.f32 1e-06, %v95_v2  ;;  %v100_v12 = vadd.f32 1e-06, %v96_v3 }
  0xaf   :  { %v82_v10 = vadd.f32 %v81_v5, %v79_v4  ;;  %v101_v11 = vmul.f32 %v97_v6, %v97_v6 }
  0xb0   :  { %v102_v13 = vmul.f32 %v98_v7, %v98_v7  ;;  %v103_v15 = vmul.f32 %v99_v8, %v99_v8  ;;  %v104_v17 = vmul.f32 %v100_v12, %v100_v12 }
  0xb1   :  { %v83_v14 = vadd.f32 %v82_v10, %v80_v9 }
  0xb2   :  { %v105_v16 = vadd.f32 %v102_v13, %v101_v11 }
  0xb3   :  { %84 = vadd.xlane.f32.xlu1 %v83_v14 }
  0xb4   :  { %v106_v18 = vadd.f32 %v105_v16, %v103_v15 }
  0xb6   :  { %v107_v19 = vadd.f32 %v106_v18, %v104_v17 }
  0xb8   :  { %108 = vadd.xlane.f32.xlu0 %v107_v19 }
 0x13c   :  { %v85_v20 = vpop.xlane.xlu1 %84 }
 0x13d   :  { %168 = vrsqrt.f32 %v85_v20  ;;  %vm88_vm0 = vcmp.eq.f32.partialorder %v85_v20, inf  ;;  %v91_v26 = vand.u32 2147483648, %v85_v20  ;;  %vm90_vm1 = vcmp.eq.f32.partialorder %v85_v20, 0.0 }
 0x141   :  { %v109_v21 = vpop.xlane.xlu0 %108 }
 0x142   :  { %170 = vrsqrt.f32 %v109_v21  ;;  %vm112_vm5 = vcmp.eq.f32.partialorder %v109_v21, inf  ;;  %v115_v33 = vand.u32 2147483648, %v109_v21  ;;  %vm114_vm6 = vcmp.eq.f32.partialorder %v109_v21, 0.0 }
 0x14a   :  { %v169_v23 = vpop.eup %168 }
 0x14b   :  { %v87_v25 = vmul.f32 %v169_v23, %v85_v20 }
 0x14d   :  { %v89_v27 = vsel %vm88_vm0, %v85_v20, %v87_v25 }
 0x14e   :  { %v92_v28 = vsel %vm90_vm1, %v91_v26, %v89_v27 }
 0x14f   :  { %v171_v29 = vpop.eup %170  ;;  %vm126_vm4 = vcmp.lt.f32.partialorder %v92_v28, 0.02 }
 0x150   :  { %v111_v30 = vmul.f32 %v171_v29, %v109_v21  ;;  %v127_v32 = vsel %vm126_vm4, 2.0, %v217_v31 }
 0x151   :  { %v128_v34 = vsel %vm125_vm2, 1.0, %v127_v32 }
 0x152   :  { %v113_v35 = vsel %vm112_vm5, %v109_v21, %v111_v30  ;;  %129 = vst.msk [vmem:[#allocation4] sm:$0x3] %vm123_vm3, %v128_v34 }
 0x153   :  { %v116_v36 = vsel %vm114_vm6, %v115_v33, %v113_v35 }
 0x154   :  { %183 = shalt.err (!%p180_p4)
}
 0x155   :  { %149 = dma.vmem_to_hbm [thread:$0]  %s147_s5, 32, %s281_s2, [#allocation5]   ;;  %vm120_vm8 = vcmp.lt.f32.partialorder %v116_v36, 0.02  ;;  %v219_v37 = vmov 2.0  }
 0x156   :  { %v121_v38 = vsel %vm120_vm8, 0.0, %v219_v37  ;;  %s192_s11 = scalar_lea.vmem %s137_s7, 32  ;;  %p197_p6 = scmp.lt.s32.totalorder %s137_s7, %s137_s7 }
 0x157   :  { %v122_v39 = vsel %vm119_vm7, 1.0, %v121_v38  ;;  %p193_p5 = scmp.ne.s32.totalorder %s137_s7, %s192_s11  ;;  %p198_p7 = scmp.lt.s32.totalorder %s192_s11, %s192_s11 }
 0x158   :  { %124 = vst.msk [vmem:[#allocation2] sm:$0x3] %vm123_vm3, %v122_v39 }
 0x159   :  { %p199_p8 = por %p198_p7, %p197_p6 }
 0x15b   :  { %p200_p9 = pnand %p199_p8, %p193_p5 }
 0x15d   :  { %203 = shalt.err (!%p200_p9)
}
 0x15e   :  { %139 = dma.vmem_to_hbm [thread:$0]  %s137_s7, 32, %s280_s1, [#allocation3]  }
 0x15f   :  { %212 = dma.done.wait [#allocation3], 32  }
 0x160   :  { %213 = vsyncadd [#allocation3], 4294967264 }
 0x161   :  { %214 = dma.done.wait [#allocation5], 32  }
 0x162   :  { %215 = vsyncadd [#allocation5], 4294967264 }
 0x163   :  { %156 = vsyncpa [#allocation3], 1 }
 0x164   :  { %157 = vsyncpa [#allocation5], 1 }

// kernel: _forward_impl.2
= control target key start
LH: loop header
LB: loop body
LE: loop exit
PB: predicated region body
PF: predicated region fallthrough
CT: control target
= control target key end

     0   :  { %8 = vsyncpa [#allocation3], 0  ;;  %s2780_s12 = smov [#allocation2]   ;;  %s2973_s0 = inlined_call_operand.vmem [shape: bf16[24,1024], index: 0, kind: input, shape index: {}]   ;;  %s2974_s1 = inlined_call_operand.hbm [shape: bf16[1024,512], index: 1, kind: input, shape index: {}]   ;;  %s2975_s2 = inlined_call_operand.vmem [shape: f32[1,512], index: 2, kind: input, shape index: {}]   ;;  %s2976_s3 = inlined_call_operand.vmem [shape: f32[24,512], index: 3, kind: output, shape index: {}]  }
   0x1   :  { %s16_s13 = sshll.u32 %s2780_s12, 4  ;;  %s17_s13 = int_to_ptr.vmem [resolvable:$true] %s16_s13 }
   0x2   :  { %s2766_s14 = scalar_lea.vmem %s17_s13, 32768  ;;  %p2771_p1 = scmp.lt.s32.totalorder %s17_s13, %s17_s13 }
   0x3   :  { %p2767_p0 = scmp.ne.s32.totalorder %s17_s13, %s2766_s14  ;;  %p2772_p2 = scmp.lt.s32.totalorder %s2766_s14, %s2766_s14 }
   0x5   :  { %p2773_p3 = por %p2772_p2, %p2771_p1 }
   0x7   :  { %p2774_p4 = pnand %p2773_p3, %p2767_p0 }
   0x9   :  { %2777 = shalt.err (!%p2774_p4)
}
   0xa   :  { %s2781_s15 = smov 256   ;;  %s2782_s16 = smov 16  }
   0xb   :  { %22 = dma.hbm_to_vmem [thread:$0]  %s2974_s1, 32768, %s17_s13, [#allocation3], %s2781_s15, %s2781_s15, %s2782_s16  }
   0xc   :  { %2778 = dma.done.wait [#allocation3], 32768  }
   0xd   :  { %2779 = vsyncadd [#allocation3], 4294934528  ;;  %v2366_v0 = vld [vmem:[#allocation2 + $0xe4] ss:$16 sps:$4 sm:$0xff]   ;;  %v2370_v2 = vld [vmem:[#allocation2 + $0xe0] ss:$16 sps:$4 sm:$0xff]  }
   0xe   :  { %v2368_v1 = vld [vmem:[#allocation2 + $0x2e4] ss:$16 sps:$4 sm:$0xff]   ;;  %1666 = vmatprep.subr.bf16.mxu0 %v2366_v0  ;;  %v2371_v3 = vld [vmem:[#allocation2 + $0x2e0] ss:$16 sps:$4 sm:$0xff]   ;;  %v29_v50 = vld [vmem:[%s2973_s0 + $0x8] sm:$0xff] }
   0xf   :  { %1717 = vmatprep.subr.bf16.mxu1 %v2368_v1  ;;  %v2372_v4 = vld [vmem:[#allocation2 + $0xc4] ss:$16 sps:$4 sm:$0xff]   ;;  %1667 = vmatpush1.bf16.msra.mxu0 %v2370_v2  ;;  %v2376_v6 = vld [vmem:[#allocation2 + $0xc0] ss:$16 sps:$4 sm:$0xff]   ;;  %v33_v51 = vld [vmem:[%s2973_s0 + $0x28] sm:$0xff] }
  0x10   :  { %1718 = vmatpush1.bf16.msra.mxu1 %v2371_v3  ;;  %v2374_v5 = vld [vmem:[#allocation2 + $0x2c4] ss:$16 sps:$4 sm:$0xff]   ;;  %1668 = vmatprep.subr.bf16.mxu0 %v2372_v4  ;;  %v2377_v7 = vld [vmem:[#allocation2 + $0x2c0] ss:$16 sps:$4 sm:$0xff]   ;;  %v2820_v55 = vcombine.high %v29_v50, %v33_v51 }
  0x11   :  { %1719 = vmatprep.subr.bf16.mxu1 %v2374_v5  ;;  %v2378_v8 = vld [vmem:[#allocation2 + $0xa4] ss:$16 sps:$4 sm:$0xff]   ;;  %v2382_v10 = vld [vmem:[#allocation2 + $0xa0] ss:$16 sps:$4 sm:$0xff]  }
  0x12   :  { %v2380_v9 = vld [vmem:[#allocation2 + $0x2a4] ss:$16 sps:$4 sm:$0xff]   ;;  %v2383_v11 = vld [vmem:[#allocation2 + $0x2a0] ss:$16 sps:$4 sm:$0xff]   ;;  %1749 = vmatprep.mubr.bf16.mxu1 %v2820_v55 }
  0x13   :  { %1669 = vmatpush1.bf16.msra.mxu0 %v2376_v6  ;;  %v2384_v12 = vld [vmem:[#allocation2 + $0x84] ss:$16 sps:$4 sm:$0xff]   ;;  %v2388_v14 = vld [vmem:[#allocation2 + $0x80] ss:$16 sps:$4 sm:$0xff]  }
  0x14   :  { %1720 = vmatpush1.bf16.msra.mxu1 %v2377_v7  ;;  %1670 = vmatprep.subr.bf16.mxu0 %v2378_v8  ;;  %v2386_v13 = vld [vmem:[#allocation2 + $0x284] ss:$16 sps:$4 sm:$0xff]   ;;  %v2389_v15 = vld [vmem:[#allocation2 + $0x280] ss:$16 sps:$4 sm:$0xff]  }
  0x15   :  { %1721 = vmatprep.subr.bf16.mxu1 %v2380_v9  ;;  %v2390_v16 = vld [vmem:[#allocation2 + $0x64] ss:$16 sps:$4 sm:$0xff]   ;;  %v2394_v18 = vld [vmem:[#allocation2 + $0x60] ss:$16 sps:$4 sm:$0xff]   ;;  %v2826_v9 = vcombine.low %v29_v50, %v33_v51 }
  0x16   :  { %v2392_v17 = vld [vmem:[#allocation2 + $0x264] ss:$16 sps:$4 sm:$0xff]   ;;  %v2395_v19 = vld [vmem:[#allocation2 + $0x260] ss:$16 sps:$4 sm:$0xff]  }
  0x17   :  { %1671 = vmatpush1.bf16.msra.mxu0 %v2382_v10  ;;  %v2396_v20 = vld [vmem:[#allocation2 + $0x44] ss:$16 sps:$4 sm:$0xff]   ;;  %v2400_v22 = vld [vmem:[#allocation2 + $0x40] ss:$16 sps:$4 sm:$0xff]  }
  0x18   :  { %1722 = vmatpush1.bf16.msra.mxu1 %v2383_v11  ;;  %1672 = vmatprep.subr.bf16.mxu0 %v2384_v12  ;;  %v2398_v21 = vld [vmem:[#allocation2 + $0x244] ss:$16 sps:$4 sm:$0xff]   ;;  %v2401_v23 = vld [vmem:[#allocation2 + $0x240] ss:$16 sps:$4 sm:$0xff]  }
  0x19   :  { %1723 = vmatprep.subr.bf16.mxu1 %v2386_v13  ;;  %v2402_v24 = vld [vmem:[#allocation2 + $0x24] ss:$16 sps:$4 sm:$0xff]   ;;  %v2406_v26 = vld [vmem:[#allocation2 + $0x20] ss:$16 sps:$4 sm:$0xff]  }
  0x1a   :  { %v2404_v25 = vld [vmem:[#allocation2 + $0x224] ss:$16 sps:$4 sm:$0xff]   ;;  %v2407_v27 = vld [vmem:[#allocation2 + $0x220] ss:$16 sps:$4 sm:$0xff]  }
  0x1b   :  { %1673 = vmatpush1.bf16.msra.mxu0 %v2388_v14  ;;  %v2408_v28 = vld [vmem:[#allocation2 + $0x4] ss:$16 sps:$4 sm:$0xff]   ;;  %v2412_v30 = vld [vmem:[#allocation2] ss:$16 sps:$4 sm:$0xff]  }
  0x1c   :  { %1724 = vmatpush1.bf16.msra.mxu1 %v2389_v15  ;;  %1674 = vmatprep.subr.bf16.mxu0 %v2390_v16  ;;  %v2410_v29 = vld [vmem:[#allocation2 + $0x204] ss:$16 sps:$4 sm:$0xff]   ;;  %v2413_v31 = vld [vmem:[#allocation2 + $0x200] ss:$16 sps:$4 sm:$0xff]  }
  0x1d   :  { %1725 = vmatprep.subr.bf16.mxu1 %v2392_v17  ;;  %v2414_v32 = vld [vmem:[#allocation2 + $0x1e4] ss:$16 sps:$4 sm:$0xff]   ;;  %v2418_v34 = vld [vmem:[#allocation2 + $0x1e0] ss:$16 sps:$4 sm:$0xff]  }
  0x1e   :  { %v2416_v33 = vld [vmem:[#allocation2 + $0x3e4] ss:$16 sps:$4 sm:$0xff]   ;;  %v2419_v35 = vld [vmem:[#allocation2 + $0x3e0] ss:$16 sps:$4 sm:$0xff]  }
  0x1f   :  { %1675 = vmatpush1.bf16.msra.mxu0 %v2394_v18  ;;  %v2420_v36 = vld [vmem:[#allocation2 + $0x1c4] ss:$16 sps:$4 sm:$0xff]   ;;  %v2424_v38 = vld [vmem:[#allocation2 + $0x1c0] ss:$16 sps:$4 sm:$0xff]  }
  0x20   :  { %1726 = vmatpush1.bf16.msra.mxu1 %v2395_v19  ;;  %1676 = vmatprep.subr.bf16.mxu0 %v2396_v20  ;;  %v2422_v37 = vld [vmem:[#allocation2 + $0x3c4] ss:$16 sps:$4 sm:$0xff]   ;;  %v2425_v39 = vld [vmem:[#allocation2 + $0x3c0] ss:$16 sps:$4 sm:$0xff]  }
  0x21   :  { %1727 = vmatprep.subr.bf16.mxu1 %v2398_v21  ;;  %v2426_v40 = vld [vmem:[#allocation2 + $0x1a4] ss:$16 sps:$4 sm:$0xff]   ;;  %v2430_v42 = vld [vmem:[#allocation2 + $0x1a0] ss:$16 sps:$4 sm:$0xff]  }
  0x22   :  { %v2428_v41 = vld [vmem:[#allocation2 + $0x3a4] ss:$16 sps:$4 sm:$0xff]   ;;  %v2431_v43 = vld [vmem:[#allocation2 + $0x3a0] ss:$16 sps:$4 sm:$0xff]  }
  0x23   :  { %1677 = vmatpush1.bf16.msra.mxu0 %v2400_v22  ;;  %v2432_v44 = vld [vmem:[#allocation2 + $0x184] ss:$16 sps:$4 sm:$0xff]   ;;  %v2436_v46 = vld [vmem:[#allocation2 + $0x180] ss:$16 sps:$4 sm:$0xff]  }
  0x24   :  { %1728 = vmatpush1.bf16.msra.mxu1 %v2401_v23  ;;  %1678 = vmatprep.subr.bf16.mxu0 %v2402_v24  ;;  %v2434_v45 = vld [vmem:[#allocation2 + $0x384] ss:$16 sps:$4 sm:$0xff]   ;;  %v2437_v47 = vld [vmem:[#allocation2 + $0x380] ss:$16 sps:$4 sm:$0xff]  }
  0x25   :  { %1729 = vmatprep.subr.bf16.mxu1 %v2404_v25  ;;  %v28_v48 = vld [vmem:[%s2973_s0] sm:$0xff] }
  0x26   :  { %v32_v49 = vld [vmem:[%s2973_s0 + $0x20] sm:$0xff] }
  0x27   :  { %1679 = vmatpush1.bf16.msra.mxu0 %v2406_v26  ;;  %v2438_v52 = vld [vmem:[#allocation2 + $0x164] ss:$16 sps:$4 sm:$0xff]   ;;  %v2818_v53 = vcombine.high %v28_v48, %v32_v49  ;;  %v2442_v56 = vld [vmem:[#allocation2 + $0x160] ss:$16 sps:$4 sm:$0xff]   ;;  %v2824_v8 = vcombine.low %v28_v48, %v32_v49 }
  0x28   :  { %1730 = vmatpush1.bf16.msra.mxu1 %v2407_v27  ;;  %1680 = vmatprep.subr.bf16.mxu0 %v2408_v28  ;;  %v2440_v54 = vld [vmem:[#allocation2 + $0x364] ss:$16 sps:$4 sm:$0xff]   ;;  %v2443_v57 = vld [vmem:[#allocation2 + $0x360] ss:$16 sps:$4 sm:$0xff]  }
  0x29   :  { %1731 = vmatprep.subr.bf16.mxu1 %v2410_v29  ;;  %1698 = vmatprep.mubr.bf16.mxu0 %v2818_v53  ;;  %v2444_v58 = vld [vmem:[#allocation2 + $0x144] ss:$16 sps:$4 sm:$0xff]   ;;  %v2448_v60 = vld [vmem:[#allocation2 + $0x140] ss:$16 sps:$4 sm:$0xff]   ;;  %v37_v29 = vld [vmem:[%s2973_s0 + $0x48] sm:$0xff] }
  0x2a   :  { %v2446_v59 = vld [vmem:[#allocation2 + $0x344] ss:$16 sps:$4 sm:$0xff]   ;;  %v2449_v61 = vld [vmem:[#allocation2 + $0x340] ss:$16 sps:$4 sm:$0xff]  }
  0x2b   :  { %1681 = vmatpush1.bf16.msra.mxu0 %v2412_v30  ;;  %v2450_v62 = vld [vmem:[#allocation2 + $0x124] ss:$16 sps:$4 sm:$0xff]   ;;  %v2454_v0 = vld [vmem:[#allocation2 + $0x120] ss:$16 sps:$4 sm:$0xff]  }
  0x2c   :  { %1732 = vmatpush1.bf16.msra.mxu1 %v2413_v31  ;;  %1682 = vmatprep.subr.bf16.mxu0 %v2414_v32  ;;  %v2452_v63 = vld [vmem:[#allocation2 + $0x324] ss:$16 sps:$4 sm:$0xff]   ;;  %v2455_v1 = vld [vmem:[#allocation2 + $0x320] ss:$16 sps:$4 sm:$0xff]   ;;  %v2840_v32 = vcombine.high %v37_v29, %v37_v29 }
  0x2d   :  { %1733 = vmatprep.subr.bf16.mxu1 %v2416_v33  ;;  %v2456_v2 = vld [vmem:[#allocation2 + $0x104] ss:$16 sps:$4 sm:$0xff]   ;;  %v2460_v4 = vld [vmem:[#allocation2 + $0x100] ss:$16 sps:$4 sm:$0xff]   ;;  %v2842_v33 = vcombine.low %v37_v29, %v37_v29  ;;  %v2565_v29 = vld [vmem:[#allocation2 + $0x2e8] ss:$16 sps:$4 sm:$0xff]  }
  0x2e   :  { %v2458_v3 = vld [vmem:[#allocation2 + $0x304] ss:$16 sps:$4 sm:$0xff]   ;;  %v2461_v5 = vld [vmem:[#allocation2 + $0x300] ss:$16 sps:$4 sm:$0xff]  }
  0x2f   :  { %1683 = vmatpush2.bf16.msra.mxu0 %v2418_v34  ;;  %v2464_v6 = vld [vmem:[#allocation2 + $0x4e4] ss:$16 sps:$4 sm:$0xff]   ;;  %v2462_v10 = vld [vmem:[#allocation2 + $0x4e0] ss:$16 sps:$4 sm:$0xff]  }
  0x30   :  { %1734 = vmatpush2.bf16.msra.mxu1 %v2419_v35  ;;  %1684 = vmatprep.subr.bf16.mxu0 %v2420_v36  ;;  %v2467_v7 = vld [vmem:[#allocation2 + $0x6e4] ss:$16 sps:$4 sm:$0xff]   ;;  %v2465_v11 = vld [vmem:[#allocation2 + $0x6e0] ss:$16 sps:$4 sm:$0xff]  }
  0x31   :  { %1735 = vmatprep.subr.bf16.mxu1 %v2422_v37  ;;  %v2470_v12 = vld [vmem:[#allocation2 + $0x4c4] ss:$16 sps:$4 sm:$0xff]   ;;  %v2468_v14 = vld [vmem:[#allocation2 + $0x4c0] ss:$16 sps:$4 sm:$0xff]  }
  0x32   :  { %v2473_v13 = vld [vmem:[#allocation2 + $0x6c4] ss:$16 sps:$4 sm:$0xff]   ;;  %v2471_v15 = vld [vmem:[#allocation2 + $0x6c0] ss:$16 sps:$4 sm:$0xff]  }
  0x33   :  { %1685 = vmatpush2.bf16.msra.mxu0 %v2424_v38  ;;  %v2476_v16 = vld [vmem:[#allocation2 + $0x4a4] ss:$16 sps:$4 sm:$0xff]   ;;  %v2474_v18 = vld [vmem:[#allocation2 + $0x4a0] ss:$16 sps:$4 sm:$0xff]  }
  0x34   :  { %1736 = vmatpush2.bf16.msra.mxu1 %v2425_v39  ;;  %1686 = vmatprep.subr.bf16.mxu0 %v2426_v40  ;;  %v2479_v17 = vld [vmem:[#allocation2 + $0x6a4] ss:$16 sps:$4 sm:$0xff]   ;;  %v2477_v19 = vld [vmem:[#allocation2 + $0x6a0] ss:$16 sps:$4 sm:$0xff]  }
  0x35   :  { %1737 = vmatprep.subr.bf16.mxu1 %v2428_v41  ;;  %v2482_v20 = vld [vmem:[#allocation2 + $0x484] ss:$16 sps:$4 sm:$0xff]   ;;  %v2480_v22 = vld [vmem:[#allocation2 + $0x480] ss:$16 sps:$4 sm:$0xff]  }
  0x36   :  { %v2485_v21 = vld [vmem:[#allocation2 + $0x684] ss:$16 sps:$4 sm:$0xff]   ;;  %v2483_v23 = vld [vmem:[#allocation2 + $0x680] ss:$16 sps:$4 sm:$0xff]  }
  0x37   :  { %1687 = vmatpush2.bf16.msra.mxu0 %v2430_v42  ;;  %v2488_v24 = vld [vmem:[#allocation2 + $0x464] ss:$16 sps:$4 sm:$0xff]   ;;  %v2486_v30 = vld [vmem:[#allocation2 + $0x460] ss:$16 sps:$4 sm:$0xff]  }
  0x38   :  { %1738 = vmatpush2.bf16.msra.mxu1 %v2431_v43  ;;  %1688 = vmatprep.subr.bf16.mxu0 %v2432_v44  ;;  %v2491_v25 = vld [vmem:[#allocation2 + $0x664] ss:$16 sps:$4 sm:$0xff]   ;;  %v2489_v31 = vld [vmem:[#allocation2 + $0x660] ss:$16 sps:$4 sm:$0xff]  }
  0x39   :  { %1739 = vmatprep.subr.bf16.mxu1 %v2434_v45  ;;  %v36_v26 = vld [vmem:[%s2973_s0 + $0x40] sm:$0xff]  ;;  %v2851_v42 = vld [vmem:[%s2973_s0 + $0x10] sm:$0xff]  ;;  %v2865_v45 = vld [vmem:[%s2973_s0 + $0x18] sm:$0xff] }
  0x3a   :  { %v2833_v27 = vcombine.high %v36_v26, %v36_v26  ;;  %v2835_v28 = vcombine.low %v36_v26, %v36_v26  ;;  %v2494_v34 = vld [vmem:[#allocation2 + $0x444] ss:$16 sps:$4 sm:$0xff]   ;;  %v2492_v36 = vld [vmem:[#allocation2 + $0x440] ss:$16 sps:$4 sm:$0xff]   ;;  %v2562_v26 = vld [vmem:[#allocation2 + $0xe8] ss:$16 sps:$4 sm:$0xff]  }
  0x3b   :  { %1689 = vmatpush2.bf16.msra.mxu0 %v2436_v46  ;;  %v2497_v35 = vld [vmem:[#allocation2 + $0x644] ss:$16 sps:$4 sm:$0xff]   ;;  %v2495_v37 = vld [vmem:[#allocation2 + $0x640] ss:$16 sps:$4 sm:$0xff]   ;;  %v2870_v46 = vld [vmem:[%s2973_s0 + $0x38] sm:$0xff] }
  0x3c   :  { %1740 = vmatpush2.bf16.msra.mxu1 %v2437_v47  ;;  %1690 = vmatprep.subr.bf16.mxu0 %v2438_v52  ;;  %v2500_v38 = vld [vmem:[#allocation2 + $0x424] ss:$16 sps:$4 sm:$0xff]   ;;  %v2498_v40 = vld [vmem:[#allocation2 + $0x420] ss:$16 sps:$4 sm:$0xff]   ;;  %v2874_v49 = vcombine.high %v2865_v45, %v2870_v46 }
  0x3d   :  { %1741 = vmatprep.subr.bf16.mxu1 %v2440_v54  ;;  %v2503_v39 = vld [vmem:[#allocation2 + $0x624] ss:$16 sps:$4 sm:$0xff]   ;;  %v2501_v41 = vld [vmem:[#allocation2 + $0x620] ss:$16 sps:$4 sm:$0xff]  }
  0x3e   :  { %v2856_v43 = vld [vmem:[%s2973_s0 + $0x30] sm:$0xff] }
  0x3f   :  { %1691 = vmatpush2.bf16.msra.mxu0 %v2442_v56  ;;  %v2860_v44 = vcombine.high %v2851_v42, %v2856_v43  ;;  %v2506_v47 = vld [vmem:[#allocation2 + $0x404] ss:$16 sps:$4 sm:$0xff]   ;;  %v2504_v50 = vld [vmem:[#allocation2 + $0x400] ss:$16 sps:$4 sm:$0xff]  }
  0x40   :  { %1742 = vmatpush2.bf16.msra.mxu1 %v2443_v57  ;;  %1692 = vmatprep.subr.bf16.mxu0 %v2444_v58  ;;  %v2509_v48 = vld [vmem:[#allocation2 + $0x604] ss:$16 sps:$4 sm:$0xff]   ;;  %v2507_v51 = vld [vmem:[#allocation2 + $0x600] ss:$16 sps:$4 sm:$0xff]  }
  0x41   :  { %1743 = vmatprep.subr.bf16.mxu1 %v2446_v59  ;;  %v2512_v52 = vld [vmem:[#allocation2 + $0x5e4] ss:$16 sps:$4 sm:$0xff]   ;;  %v2510_v56 = vld [vmem:[#allocation2 + $0x5e0] ss:$16 sps:$4 sm:$0xff]  }
  0x42   :  { %v2515_v54 = vld [vmem:[#allocation2 + $0x7e4] ss:$16 sps:$4 sm:$0xff]   ;;  %v2513_v57 = vld [vmem:[#allocation2 + $0x7e0] ss:$16 sps:$4 sm:$0xff]  }
  0x43   :  { %1693 = vmatpush2.bf16.msra.mxu0 %v2448_v60  ;;  %v2518_v58 = vld [vmem:[#allocation2 + $0x5c4] ss:$16 sps:$4 sm:$0xff]   ;;  %v2516_v60 = vld [vmem:[#allocation2 + $0x5c0] ss:$16 sps:$4 sm:$0xff]  }
  0x44   :  { %1744 = vmatpush2.bf16.msra.mxu1 %v2449_v61  ;;  %1694 = vmatprep.subr.bf16.mxu0 %v2450_v62  ;;  %v2521_v59 = vld [vmem:[#allocation2 + $0x7c4] ss:$16 sps:$4 sm:$0xff]   ;;  %v2519_v61 = vld [vmem:[#allocation2 + $0x7c0] ss:$16 sps:$4 sm:$0xff]  }
  0x45   :  { %1745 = vmatprep.subr.bf16.mxu1 %v2452_v63  ;;  %v2524_v62 = vld [vmem:[#allocation2 + $0x5a4] ss:$16 sps:$4 sm:$0xff]  }
  0x46   :  { %v2527_v63 = vld [vmem:[#allocation2 + $0x7a4] ss:$16 sps:$4 sm:$0xff]  }
  0x47   :  { %1695 = vmatpush2.bf16.msra.mxu0 %v2454_v0  ;;  %v2522_v0 = vld [vmem:[#allocation2 + $0x5a0] ss:$16 sps:$4 sm:$0xff]  }
  0x48   :  { %1746 = vmatpush2.bf16.msra.mxu1 %v2455_v1  ;;  %1696 = vmatprep.subr.bf16.mxu0 %v2456_v2  ;;  %v2525_v1 = vld [vmem:[#allocation2 + $0x7a0] ss:$16 sps:$4 sm:$0xff]   ;;  %v2530_v2 = vld [vmem:[#allocation2 + $0x584] ss:$16 sps:$4 sm:$0xff]  }
  0x49   :  { %1747 = vmatprep.subr.bf16.mxu1 %v2458_v3  ;;  %v2533_v3 = vld [vmem:[#allocation2 + $0x784] ss:$16 sps:$4 sm:$0xff]  }
  0x4b   :  { %1697 = vmatpush2.bf16.msra.mxu0 %v2460_v4  ;;  %v2528_v4 = vld [vmem:[#allocation2 + $0x580] ss:$16 sps:$4 sm:$0xff]  }
  0x4c   :  { %1748 = vmatpush2.bf16.msra.mxu1 %v2461_v5  ;;  %1768 = vmatprep.subr.bf16.mxu0 %v2464_v6  ;;  %v2531_v5 = vld [vmem:[#allocation2 + $0x780] ss:$16 sps:$4 sm:$0xff]   ;;  %v2536_v6 = vld [vmem:[#allocation2 + $0x564] ss:$16 sps:$4 sm:$0xff]  }
  0x4d   :  { %1819 = vmatprep.subr.bf16.mxu1 %v2467_v7  ;;  %v2539_v7 = vld [vmem:[#allocation2 + $0x764] ss:$16 sps:$4 sm:$0xff]  }
  0x4e   :  { %1699 = vmatmul.mubr.bf16.vlgmr.msra.gmra.mxu0 %v2824_v8 }
  0x4f   :  { %1750 = vmatmul.mubr.bf16.vlgmr.msra.gmra.mxu1 %v2826_v9  ;;  %1769 = vmatpush1.bf16.msra.mxu0 %v2462_v10  ;;  %v2534_v10 = vld [vmem:[#allocation2 + $0x560] ss:$16 sps:$4 sm:$0xff]  }
  0x50   :  { %1820 = vmatpush1.bf16.msra.mxu1 %v2465_v11  ;;  %1770 = vmatprep.subr.bf16.mxu0 %v2470_v12  ;;  %v2537_v11 = vld [vmem:[#allocation2 + $0x760] ss:$16 sps:$4 sm:$0xff]   ;;  %v2546_v12 = vld [vmem:[#allocation2 + $0x544] ss:$16 sps:$4 sm:$0xff]  }
  0x51   :  { %1821 = vmatprep.subr.bf16.mxu1 %v2473_v13  ;;  %1708 = vmatprep.mubr.bf16.mxu0 %v2833_v27  ;;  %v2549_v13 = vld [vmem:[#allocation2 + $0x744] ss:$16 sps:$4 sm:$0xff]  }
  0x52   :  { %1759 = vmatprep.mubr.bf16.mxu1 %v2840_v32 }
  0x53   :  { %1771 = vmatpush1.bf16.msra.mxu0 %v2468_v14  ;;  %v2544_v14 = vld [vmem:[#allocation2 + $0x540] ss:$16 sps:$4 sm:$0xff]  }
  0x54   :  { %1822 = vmatpush1.bf16.msra.mxu1 %v2471_v15  ;;  %1772 = vmatprep.subr.bf16.mxu0 %v2476_v16  ;;  %v2547_v15 = vld [vmem:[#allocation2 + $0x740] ss:$16 sps:$4 sm:$0xff]   ;;  %v2552_v16 = vld [vmem:[#allocation2 + $0x524] ss:$16 sps:$4 sm:$0xff]  }
  0x55   :  { %1823 = vmatprep.subr.bf16.mxu1 %v2479_v17  ;;  %v2555_v17 = vld [vmem:[#allocation2 + $0x724] ss:$16 sps:$4 sm:$0xff]  }
  0x56   :  { %1709 = vmatmul.mubr.bf16.gmra.mxu0 %v2835_v28 }
  0x57   :  { %1773 = vmatpush1.bf16.msra.mxu0 %v2474_v18  ;;  %1760 = vmatmul.mubr.bf16.gmra.mxu1 %v2842_v33  ;;  %v2550_v18 = vld [vmem:[#allocation2 + $0x520] ss:$16 sps:$4 sm:$0xff]  }
  0x58   :  { %1824 = vmatpush1.bf16.msra.mxu1 %v2477_v19  ;;  %1774 = vmatprep.subr.bf16.mxu0 %v2482_v20  ;;  %v2553_v19 = vld [vmem:[#allocation2 + $0x720] ss:$16 sps:$4 sm:$0xff]   ;;  %v2558_v20 = vld [vmem:[#allocation2 + $0x504] ss:$16 sps:$4 sm:$0xff]  }
  0x59   :  { %1825 = vmatprep.subr.bf16.mxu1 %v2485_v21  ;;  %1800 = vmatprep.mubr.bf16.mxu0 %v2860_v44  ;;  %v2561_v21 = vld [vmem:[#allocation2 + $0x704] ss:$16 sps:$4 sm:$0xff]  }
  0x5a   :  { %1851 = vmatprep.mubr.bf16.mxu1 %v2874_v49 }
  0x5b   :  { %1775 = vmatpush1.bf16.msra.mxu0 %v2480_v22  ;;  %v2556_v22 = vld [vmem:[#allocation2 + $0x500] ss:$16 sps:$4 sm:$0xff]  }
  0x5c   :  { %1826 = vmatpush1.bf16.msra.mxu1 %v2483_v23  ;;  %1776 = vmatprep.subr.bf16.mxu0 %v2488_v24  ;;  %v2559_v23 = vld [vmem:[#allocation2 + $0x700] ss:$16 sps:$4 sm:$0xff]   ;;  %v2564_v24 = vld [vmem:[#allocation2 + $0xec] ss:$16 sps:$4 sm:$0xff]  }
  0x5d   :  { %1827 = vmatprep.subr.bf16.mxu1 %v2491_v25  ;;  %v2567_v25 = vld [vmem:[#allocation2 + $0x2ec] ss:$16 sps:$4 sm:$0xff]  }
  0x5f   :  { %1777 = vmatpush1.bf16.msra.mxu0 %v2486_v30  ;;  %v2880_v30 = vcombine.low %v2851_v42, %v2856_v43  ;;  %v2578_v42 = vld [vmem:[#allocation2 + $0xac] ss:$16 sps:$4 sm:$0xff]  }
  0x60   :  { %1828 = vmatpush1.bf16.msra.mxu1 %v2489_v31  ;;  %1778 = vmatprep.subr.bf16.mxu0 %v2494_v34  ;;  %v2884_v31 = vcombine.low %v2865_v45, %v2870_v46  ;;  %v38_v34 = vld [vmem:[%s2973_s0 + $0x50] sm:$0xff]  ;;  %v2581_v43 = vld [vmem:[#allocation2 + $0x2ac] ss:$16 sps:$4 sm:$0xff]   ;;  %v2576_v46 = vld [vmem:[#allocation2 + $0xa8] ss:$16 sps:$4 sm:$0xff]  }
  0x61   :  { %1829 = vmatprep.subr.bf16.mxu1 %v2497_v35  ;;  %v39_v35 = vld [vmem:[%s2973_s0 + $0x58] sm:$0xff]  ;;  %v2900_v45 = vcombine.low %v38_v34, %v38_v34 }
  0x63   :  { %1779 = vmatpush1.bf16.msra.mxu0 %v2492_v36  ;;  %v2570_v36 = vld [vmem:[#allocation2 + $0xcc] ss:$16 sps:$4 sm:$0xff]  }
  0x64   :  { %1830 = vmatpush1.bf16.msra.mxu1 %v2495_v37  ;;  %1780 = vmatprep.subr.bf16.mxu0 %v2500_v38  ;;  %v2573_v37 = vld [vmem:[#allocation2 + $0x2cc] ss:$16 sps:$4 sm:$0xff]   ;;  %v2892_v38 = vcombine.high %v38_v34, %v38_v34 }
  0x65   :  { %1831 = vmatprep.subr.bf16.mxu1 %v2503_v39  ;;  %v2894_v39 = vcombine.high %v39_v35, %v39_v35  ;;  %v2646_v34 = vld [vmem:[#allocation2 + $0x14c] ss:$16 sps:$4 sm:$0xff]  }
  0x67   :  { %1781 = vmatpush1.bf16.msra.mxu0 %v2498_v40  ;;  %v2568_v40 = vld [vmem:[#allocation2 + $0xc8] ss:$16 sps:$4 sm:$0xff]  }
  0x68   :  { %1832 = vmatpush1.bf16.msra.mxu1 %v2501_v41  ;;  %1782 = vmatprep.subr.bf16.mxu0 %v2506_v47  ;;  %v2571_v41 = vld [vmem:[#allocation2 + $0x2c8] ss:$16 sps:$4 sm:$0xff]  }
  0x69   :  { %1833 = vmatprep.subr.bf16.mxu1 %v2509_v48  ;;  %v2579_v47 = vld [vmem:[#allocation2 + $0x2a8] ss:$16 sps:$4 sm:$0xff]   ;;  %v2902_v48 = vcombine.low %v39_v35, %v39_v35  ;;  %v2649_v35 = vld [vmem:[#allocation2 + $0x34c] ss:$16 sps:$4 sm:$0xff]  }
  0x6b   :  { %1783 = vmatpush1.bf16.msra.mxu0 %v2504_v50  ;;  %v2586_v50 = vld [vmem:[#allocation2 + $0x8c] ss:$16 sps:$4 sm:$0xff]  }
  0x6c   :  { %1834 = vmatpush1.bf16.msra.mxu1 %v2507_v51  ;;  %1784 = vmatprep.subr.bf16.mxu0 %v2512_v52  ;;  %v2589_v51 = vld [vmem:[#allocation2 + $0x28c] ss:$16 sps:$4 sm:$0xff]   ;;  %v2584_v52 = vld [vmem:[#allocation2 + $0x88] ss:$16 sps:$4 sm:$0xff]  }
  0x6d   :  { %1835 = vmatprep.subr.bf16.mxu1 %v2515_v54  ;;  %v2587_v54 = vld [vmem:[#allocation2 + $0x288] ss:$16 sps:$4 sm:$0xff]  }
  0x6f   :  { %1785 = vmatpush2.bf16.msra.mxu0 %v2510_v56  ;;  %v2592_v56 = vld [vmem:[#allocation2 + $0x6c] ss:$16 sps:$4 sm:$0xff]  }
  0x70   :  { %1836 = vmatpush2.bf16.msra.mxu1 %v2513_v57  ;;  %1786 = vmatprep.subr.bf16.mxu0 %v2518_v58  ;;  %v2595_v57 = vld [vmem:[#allocation2 + $0x26c] ss:$16 sps:$4 sm:$0xff]   ;;  %v2590_v58 = vld [vmem:[#allocation2 + $0x68] ss:$16 sps:$4 sm:$0xff]  }
  0x71   :  { %1837 = vmatprep.subr.bf16.mxu1 %v2521_v59  ;;  %v2593_v59 = vld [vmem:[#allocation2 + $0x268] ss:$16 sps:$4 sm:$0xff]  }
  0x73   :  { %1787 = vmatpush2.bf16.msra.mxu0 %v2516_v60  ;;  %v2598_v60 = vld [vmem:[#allocation2 + $0x4c] ss:$16 sps:$4 sm:$0xff]  }
  0x74   :  { %1838 = vmatpush2.bf16.msra.mxu1 %v2519_v61  ;;  %1788 = vmatprep.subr.bf16.mxu0 %v2524_v62  ;;  %v2601_v61 = vld [vmem:[#allocation2 + $0x24c] ss:$16 sps:$4 sm:$0xff]   ;;  %v2596_v62 = vld [vmem:[#allocation2 + $0x48] ss:$16 sps:$4 sm:$0xff]  }
  0x75   :  { %1839 = vmatprep.subr.bf16.mxu1 %v2527_v63  ;;  %v2599_v63 = vld [vmem:[#allocation2 + $0x248] ss:$16 sps:$4 sm:$0xff]  }
  0x77   :  { %1789 = vmatpush2.bf16.msra.mxu0 %v2522_v0  ;;  %v2604_v0 = vld [vmem:[#allocation2 + $0x2c] ss:$16 sps:$4 sm:$0xff]  }
  0x78   :  { %1840 = vmatpush2.bf16.msra.mxu1 %v2525_v1  ;;  %1790 = vmatprep.subr.bf16.mxu0 %v2530_v2  ;;  %v2607_v1 = vld [vmem:[#allocation2 + $0x22c] ss:$16 sps:$4 sm:$0xff]   ;;  %v2602_v2 = vld [vmem:[#allocation2 + $0x28] ss:$16 sps:$4 sm:$0xff]  }
  0x79   :  { %1841 = vmatprep.subr.bf16.mxu1 %v2533_v3  ;;  %v2613_v3 = vld [vmem:[#allocation2 + $0x20c] ss:$16 sps:$4 sm:$0xff]  }
  0x7b   :  { %1791 = vmatpush2.bf16.msra.mxu0 %v2528_v4  ;;  %v2608_v4 = vld [vmem:[#allocation2 + $0x8] ss:$16 sps:$4 sm:$0xff]  }
  0x7c   :  { %1842 = vmatpush2.bf16.msra.mxu1 %v2531_v5  ;;  %1792 = vmatprep.subr.bf16.mxu0 %v2536_v6  ;;  %v2611_v5 = vld [vmem:[#allocation2 + $0x208] ss:$16 sps:$4 sm:$0xff]   ;;  %v2616_v6 = vld [vmem:[#allocation2 + $0x1ec] ss:$16 sps:$4 sm:$0xff]  }
  0x7d   :  { %1843 = vmatprep.subr.bf16.mxu1 %v2539_v7  ;;  %v2619_v7 = vld [vmem:[#allocation2 + $0x3ec] ss:$16 sps:$4 sm:$0xff]  }
  0x7f   :  { %1793 = vmatpush2.bf16.msra.mxu0 %v2534_v10  ;;  %v2614_v10 = vld [vmem:[#allocation2 + $0x1e8] ss:$16 sps:$4 sm:$0xff]  }
  0x80   :  { %1844 = vmatpush2.bf16.msra.mxu1 %v2537_v11  ;;  %1794 = vmatprep.subr.bf16.mxu0 %v2546_v12  ;;  %v2617_v11 = vld [vmem:[#allocation2 + $0x3e8] ss:$16 sps:$4 sm:$0xff]   ;;  %v2622_v12 = vld [vmem:[#allocation2 + $0x1cc] ss:$16 sps:$4 sm:$0xff]  }
  0x81   :  { %1845 = vmatprep.subr.bf16.mxu1 %v2549_v13  ;;  %v2625_v13 = vld [vmem:[#allocation2 + $0x3cc] ss:$16 sps:$4 sm:$0xff]  }
  0x83   :  { %1795 = vmatpush2.bf16.msra.mxu0 %v2544_v14  ;;  %v2620_v14 = vld [vmem:[#allocation2 + $0x1c8] ss:$16 sps:$4 sm:$0xff]  }
  0x84   :  { %1846 = vmatpush2.bf16.msra.mxu1 %v2547_v15  ;;  %1796 = vmatprep.subr.bf16.mxu0 %v2552_v16  ;;  %v2623_v15 = vld [vmem:[#allocation2 + $0x3c8] ss:$16 sps:$4 sm:$0xff]   ;;  %v2628_v16 = vld [vmem:[#allocation2 + $0x1ac] ss:$16 sps:$4 sm:$0xff]  }
  0x85   :  { %1847 = vmatprep.subr.bf16.mxu1 %v2555_v17  ;;  %v2631_v17 = vld [vmem:[#allocation2 + $0x3ac] ss:$16 sps:$4 sm:$0xff]  }
  0x87   :  { %1797 = vmatpush2.bf16.msra.mxu0 %v2550_v18  ;;  %v2626_v18 = vld [vmem:[#allocation2 + $0x1a8] ss:$16 sps:$4 sm:$0xff]  }
  0x88   :  { %1848 = vmatpush2.bf16.msra.mxu1 %v2553_v19  ;;  %1798 = vmatprep.subr.bf16.mxu0 %v2558_v20  ;;  %v2629_v19 = vld [vmem:[#allocation2 + $0x3a8] ss:$16 sps:$4 sm:$0xff]   ;;  %v2634_v20 = vld [vmem:[#allocation2 + $0x18c] ss:$16 sps:$4 sm:$0xff]  }
  0x89   :  { %1849 = vmatprep.subr.bf16.mxu1 %v2561_v21  ;;  %v2637_v21 = vld [vmem:[#allocation2 + $0x38c] ss:$16 sps:$4 sm:$0xff]  }
  0x8b   :  { %1799 = vmatpush2.bf16.msra.mxu0 %v2556_v22  ;;  %v2632_v22 = vld [vmem:[#allocation2 + $0x188] ss:$16 sps:$4 sm:$0xff]  }
  0x8c   :  { %1850 = vmatpush2.bf16.msra.mxu1 %v2559_v23  ;;  %1870 = vmatprep.subr.bf16.mxu0 %v2564_v24  ;;  %v2635_v23 = vld [vmem:[#allocation2 + $0x388] ss:$16 sps:$4 sm:$0xff]   ;;  %v2640_v24 = vld [vmem:[#allocation2 + $0x16c] ss:$16 sps:$4 sm:$0xff]  }
  0x8d   :  { %1921 = vmatprep.subr.bf16.mxu1 %v2567_v25  ;;  %v2643_v25 = vld [vmem:[#allocation2 + $0x36c] ss:$16 sps:$4 sm:$0xff]  }
  0x8e   :  { %1801 = vmatmul.mubr.bf16.vlgmr.msra.gmra.mxu0 %v2880_v30 }
  0x8f   :  { %1852 = vmatmul.mubr.bf16.vlgmr.msra.gmra.mxu1 %v2884_v31  ;;  %1871 = vmatpush1.bf16.msra.mxu0 %v2562_v26  ;;  %v2638_v26 = vld [vmem:[#allocation2 + $0x168] ss:$16 sps:$4 sm:$0xff]  }
  0x90   :  { %1922 = vmatpush1.bf16.msra.mxu1 %v2565_v29  ;;  %1872 = vmatprep.subr.bf16.mxu0 %v2570_v36  ;;  %v2641_v29 = vld [vmem:[#allocation2 + $0x368] ss:$16 sps:$4 sm:$0xff]  }
  0x91   :  { %1923 = vmatprep.subr.bf16.mxu1 %v2573_v37  ;;  %1810 = vmatprep.mubr.bf16.mxu0 %v2892_v38  ;;  %v2644_v36 = vld [vmem:[#allocation2 + $0x148] ss:$16 sps:$4 sm:$0xff]  }
  0x92   :  { %1861 = vmatprep.mubr.bf16.mxu1 %v2894_v39  ;;  %v2647_v37 = vld [vmem:[#allocation2 + $0x348] ss:$16 sps:$4 sm:$0xff]  }
  0x93   :  { %1873 = vmatpush1.bf16.msra.mxu0 %v2568_v40  ;;  %v2652_v40 = vld [vmem:[#allocation2 + $0x12c] ss:$16 sps:$4 sm:$0xff]  }
  0x94   :  { %1924 = vmatpush1.bf16.msra.mxu1 %v2571_v41  ;;  %1874 = vmatprep.subr.bf16.mxu0 %v2578_v42  ;;  %v2655_v41 = vld [vmem:[#allocation2 + $0x32c] ss:$16 sps:$4 sm:$0xff]   ;;  %v2650_v42 = vld [vmem:[#allocation2 + $0x128] ss:$16 sps:$4 sm:$0xff]  }
  0x95   :  { %1925 = vmatprep.subr.bf16.mxu1 %v2581_v43  ;;  %v2653_v43 = vld [vmem:[#allocation2 + $0x328] ss:$16 sps:$4 sm:$0xff]  }
  0x96   :  { %1811 = vmatmul.mubr.bf16.gmra.mxu0 %v2900_v45 }
  0x97   :  { %1862 = vmatmul.mubr.bf16.gmra.mxu1 %v2902_v48  ;;  %1875 = vmatpush1.bf16.msra.mxu0 %v2576_v46  ;;  %v2658_v46 = vld [vmem:[#allocation2 + $0x10c] ss:$16 sps:$4 sm:$0xff]  }
  0x98   :  { %1926 = vmatpush1.bf16.msra.mxu1 %v2579_v47  ;;  %1876 = vmatprep.subr.bf16.mxu0 %v2586_v50  ;;  %v2661_v47 = vld [vmem:[#allocation2 + $0x30c] ss:$16 sps:$4 sm:$0xff]   ;;  %v2656_v50 = vld [vmem:[#allocation2 + $0x108] ss:$16 sps:$4 sm:$0xff]  }
  0x99   :  { %1927 = vmatprep.subr.bf16.mxu1 %v2589_v51  ;;  %1902 = vmatprep.mubr.bf16.mxu0 %v2818_v53  ;;  %v2605_v53 = vld [vmem:[#allocation2 + $0x228] ss:$16 sps:$4 sm:$0xff]  }
  0x9a   :  { %1953 = vmatprep.mubr.bf16.mxu1 %v2820_v55  ;;  %v2610_v55 = vld [vmem:[#allocation2 + $0xc] ss:$16 sps:$4 sm:$0xff]   ;;  %v2659_v51 = vld [vmem:[#allocation2 + $0x308] ss:$16 sps:$4 sm:$0xff]  }
  0x9b   :  { %1877 = vmatpush1.bf16.msra.mxu0 %v2584_v52  ;;  %v2664_v52 = vld [vmem:[#allocation2 + $0x4ec] ss:$16 sps:$4 sm:$0xff]  }
  0x9c   :  { %1928 = vmatpush1.bf16.msra.mxu1 %v2587_v54  ;;  %1878 = vmatprep.subr.bf16.mxu0 %v2592_v56  ;;  %v2667_v54 = vld [vmem:[#allocation2 + $0x6ec] ss:$16 sps:$4 sm:$0xff]   ;;  %v2662_v56 = vld [vmem:[#allocation2 + $0x4e8] ss:$16 sps:$4 sm:$0xff]  }
  0x9d   :  { %1929 = vmatprep.subr.bf16.mxu1 %v2595_v57  ;;  %v2665_v57 = vld [vmem:[#allocation2 + $0x6e8] ss:$16 sps:$4 sm:$0xff]  }
  0x9f   :  { %1879 = vmatpush1.bf16.msra.mxu0 %v2590_v58  ;;  %v2670_v58 = vld [vmem:[#allocation2 + $0x4cc] ss:$16 sps:$4 sm:$0xff]  }
  0xa0   :  { %1930 = vmatpush1.bf16.msra.mxu1 %v2593_v59  ;;  %1880 = vmatprep.subr.bf16.mxu0 %v2598_v60  ;;  %v2673_v59 = vld [vmem:[#allocation2 + $0x6cc] ss:$16 sps:$4 sm:$0xff]   ;;  %v2668_v60 = vld [vmem:[#allocation2 + $0x4c8] ss:$16 sps:$4 sm:$0xff]  }
  0xa1   :  { %1931 = vmatprep.subr.bf16.mxu1 %v2601_v61  ;;  %v2671_v61 = vld [vmem:[#allocation2 + $0x6c8] ss:$16 sps:$4 sm:$0xff]  }
  0xa3   :  { %1881 = vmatpush1.bf16.msra.mxu0 %v2596_v62  ;;  %v2676_v62 = vld [vmem:[#allocation2 + $0x4ac] ss:$16 sps:$4 sm:$0xff]  }
  0xa4   :  { %1932 = vmatpush1.bf16.msra.mxu1 %v2599_v63  ;;  %1882 = vmatprep.subr.bf16.mxu0 %v2604_v0  ;;  %v2679_v63 = vld [vmem:[#allocation2 + $0x6ac] ss:$16 sps:$4 sm:$0xff]   ;;  %v2674_v0 = vld [vmem:[#allocation2 + $0x4a8] ss:$16 sps:$4 sm:$0xff]  }
  0xa5   :  { %1933 = vmatprep.subr.bf16.mxu1 %v2607_v1  ;;  %v2677_v1 = vld [vmem:[#allocation2 + $0x6a8] ss:$16 sps:$4 sm:$0xff]  }
  0xa7   :  { %1883 = vmatpush1.bf16.msra.mxu0 %v2602_v2  ;;  %v2680_v2 = vld [vmem:[#allocation2 + $0x488] ss:$16 sps:$4 sm:$0xff]  }
  0xa8   :  { %1934 = vmatpush1.bf16.msra.mxu1 %v2605_v53  ;;  %1884 = vmatprep.subr.bf16.mxu0 %v2610_v55  ;;  %v2683_v53 = vld [vmem:[#allocation2 + $0x688] ss:$16 sps:$4 sm:$0xff]  }
  0xa9   :  { %1935 = vmatprep.subr.bf16.mxu1 %v2613_v3  ;;  %v2686_v55 = vld [vmem:[#allocation2 + $0x468] ss:$16 sps:$4 sm:$0xff]  }
  0xaa   :  { %v2689_v3 = vld [vmem:[#allocation2 + $0x668] ss:$16 sps:$4 sm:$0xff]  }
  0xab   :  { %1885 = vmatpush1.bf16.msra.mxu0 %v2608_v4  ;;  %v2692_v4 = vld [vmem:[#allocation2 + $0x448] ss:$16 sps:$4 sm:$0xff]  }
  0xac   :  { %1936 = vmatpush1.bf16.msra.mxu1 %v2611_v5  ;;  %1886 = vmatprep.subr.bf16.mxu0 %v2616_v6  ;;  %v2695_v5 = vld [vmem:[#allocation2 + $0x648] ss:$16 sps:$4 sm:$0xff]   ;;  %v2700_v6 = vld [vmem:[#allocation2 + $0x42c] ss:$16 sps:$4 sm:$0xff]  }
  0xad   :  { %1937 = vmatprep.subr.bf16.mxu1 %v2619_v7  ;;  %v2703_v7 = vld [vmem:[#allocation2 + $0x62c] ss:$16 sps:$4 sm:$0xff]  }
  0xaf   :  { %1887 = vmatpush2.bf16.msra.mxu0 %v2614_v10  ;;  %v2706_v10 = vld [vmem:[#allocation2 + $0x40c] ss:$16 sps:$4 sm:$0xff]  }
  0xb0   :  { %1938 = vmatpush2.bf16.msra.mxu1 %v2617_v11  ;;  %1888 = vmatprep.subr.bf16.mxu0 %v2622_v12  ;;  %v2709_v11 = vld [vmem:[#allocation2 + $0x60c] ss:$16 sps:$4 sm:$0xff]   ;;  %v2704_v12 = vld [vmem:[#allocation2 + $0x408] ss:$16 sps:$4 sm:$0xff]  }
  0xb1   :  { %1939 = vmatprep.subr.bf16.mxu1 %v2625_v13  ;;  %v2707_v13 = vld [vmem:[#allocation2 + $0x608] ss:$16 sps:$4 sm:$0xff]  }
  0xb3   :  { %1889 = vmatpush2.bf16.msra.mxu0 %v2620_v14  ;;  %v2712_v14 = vld [vmem:[#allocation2 + $0x5ec] ss:$16 sps:$4 sm:$0xff]  }
  0xb4   :  { %1940 = vmatpush2.bf16.msra.mxu1 %v2623_v15  ;;  %1890 = vmatprep.subr.bf16.mxu0 %v2628_v16  ;;  %v2715_v15 = vld [vmem:[#allocation2 + $0x7ec] ss:$16 sps:$4 sm:$0xff]   ;;  %v2710_v16 = vld [vmem:[#allocation2 + $0x5e8] ss:$16 sps:$4 sm:$0xff]  }
  0xb5   :  { %1941 = vmatprep.subr.bf16.mxu1 %v2631_v17  ;;  %v2713_v17 = vld [vmem:[#allocation2 + $0x7e8] ss:$16 sps:$4 sm:$0xff]  }
  0xb7   :  { %1891 = vmatpush2.bf16.msra.mxu0 %v2626_v18  ;;  %v2718_v18 = vld [vmem:[#allocation2 + $0x5cc] ss:$16 sps:$4 sm:$0xff]  }
  0xb8   :  { %1942 = vmatpush2.bf16.msra.mxu1 %v2629_v19  ;;  %1892 = vmatprep.subr.bf16.mxu0 %v2634_v20  ;;  %v2721_v19 = vld [vmem:[#allocation2 + $0x7cc] ss:$16 sps:$4 sm:$0xff]   ;;  %v2716_v20 = vld [vmem:[#allocation2 + $0x5c8] ss:$16 sps:$4 sm:$0xff]  }
  0xb9   :  { %1943 = vmatprep.subr.bf16.mxu1 %v2637_v21  ;;  %v2719_v21 = vld [vmem:[#allocation2 + $0x7c8] ss:$16 sps:$4 sm:$0xff]  }
  0xbb   :  { %1893 = vmatpush2.bf16.msra.mxu0 %v2632_v22  ;;  %v2724_v22 = vld [vmem:[#allocation2 + $0x5ac] ss:$16 sps:$4 sm:$0xff]  }
  0xbc   :  { %1944 = vmatpush2.bf16.msra.mxu1 %v2635_v23  ;;  %1894 = vmatprep.subr.bf16.mxu0 %v2640_v24  ;;  %v2727_v23 = vld [vmem:[#allocation2 + $0x7ac] ss:$16 sps:$4 sm:$0xff]   ;;  %v2722_v24 = vld [vmem:[#allocation2 + $0x5a8] ss:$16 sps:$4 sm:$0xff]  }
  0xbd   :  { %1945 = vmatprep.subr.bf16.mxu1 %v2643_v25  ;;  %v2725_v25 = vld [vmem:[#allocation2 + $0x7a8] ss:$16 sps:$4 sm:$0xff]  }
  0xbf   :  { %1895 = vmatpush2.bf16.msra.mxu0 %v2638_v26  ;;  %v2730_v26 = vld [vmem:[#allocation2 + $0x58c] ss:$16 sps:$4 sm:$0xff]  }
  0xc0   :  { %1946 = vmatpush2.bf16.msra.mxu1 %v2641_v29  ;;  %1896 = vmatprep.subr.bf16.mxu0 %v2646_v34  ;;  %v2733_v29 = vld [vmem:[#allocation2 + $0x78c] ss:$16 sps:$4 sm:$0xff]   ;;  %v2728_v34 = vld [vmem:[#allocation2 + $0x588] ss:$16 sps:$4 sm:$0xff]  }
  0xc1   :  { %1947 = vmatprep.subr.bf16.mxu1 %v2649_v35  ;;  %v2731_v35 = vld [vmem:[#allocation2 + $0x788] ss:$16 sps:$4 sm:$0xff]  }
  0xc3   :  { %1897 = vmatpush2.bf16.msra.mxu0 %v2644_v36  ;;  %v2736_v36 = vld [vmem:[#allocation2 + $0x56c] ss:$16 sps:$4 sm:$0xff]  }
  0xc4   :  { %1948 = vmatpush2.bf16.msra.mxu1 %v2647_v37  ;;  %1898 = vmatprep.subr.bf16.mxu0 %v2652_v40  ;;  %v2739_v37 = vld [vmem:[#allocation2 + $0x76c] ss:$16 sps:$4 sm:$0xff]   ;;  %v2734_v40 = vld [vmem:[#allocation2 + $0x568] ss:$16 sps:$4 sm:$0xff]  }
  0xc5   :  { %1949 = vmatprep.subr.bf16.mxu1 %v2655_v41  ;;  %v2737_v41 = vld [vmem:[#allocation2 + $0x768] ss:$16 sps:$4 sm:$0xff]  }
  0xc7   :  { %1899 = vmatpush2.bf16.msra.mxu0 %v2650_v42  ;;  %v2742_v42 = vld [vmem:[#allocation2 + $0x54c] ss:$16 sps:$4 sm:$0xff]  }
  0xc8   :  { %1950 = vmatpush2.bf16.msra.mxu1 %v2653_v43  ;;  %1900 = vmatprep.subr.bf16.mxu0 %v2658_v46  ;;  %v2745_v43 = vld [vmem:[#allocation2 + $0x74c] ss:$16 sps:$4 sm:$0xff]   ;;  %v2740_v46 = vld [vmem:[#allocation2 + $0x548] ss:$16 sps:$4 sm:$0xff]  }
  0xc9   :  { %1951 = vmatprep.subr.bf16.mxu1 %v2661_v47  ;;  %v2743_v47 = vld [vmem:[#allocation2 + $0x748] ss:$16 sps:$4 sm:$0xff]  }
  0xcb   :  { %1901 = vmatpush2.bf16.msra.mxu0 %v2656_v50  ;;  %v2748_v50 = vld [vmem:[#allocation2 + $0x52c] ss:$16 sps:$4 sm:$0xff]  }
  0xcc   :  { %1952 = vmatpush2.bf16.msra.mxu1 %v2659_v51  ;;  %1972 = vmatprep.subr.bf16.mxu0 %v2664_v52  ;;  %v2751_v51 = vld [vmem:[#allocation2 + $0x72c] ss:$16 sps:$4 sm:$0xff]   ;;  %v2746_v52 = vld [vmem:[#allocation2 + $0x528] ss:$16 sps:$4 sm:$0xff]  }
  0xcd   :  { %2023 = vmatprep.subr.bf16.mxu1 %v2667_v54  ;;  %v2749_v54 = vld [vmem:[#allocation2 + $0x728] ss:$16 sps:$4 sm:$0xff]  }
  0xce   :  { %1903 = vmatmul.mubr.bf16.vlgmr.msra.gmra.mxu0 %v2824_v8  ;;  %v2682_v8 = vld [vmem:[#allocation2 + $0x48c] ss:$16 sps:$4 sm:$0xff]  }
  0xcf   :  { %1954 = vmatmul.mubr.bf16.vlgmr.msra.gmra.mxu1 %v2826_v9  ;;  %1973 = vmatpush1.bf16.msra.mxu0 %v2662_v56  ;;  %v2685_v9 = vld [vmem:[#allocation2 + $0x68c] ss:$16 sps:$4 sm:$0xff]  }
  0xd0   :  { %2024 = vmatpush1.bf16.msra.mxu1 %v2665_v57  ;;  %1974 = vmatprep.subr.bf16.mxu0 %v2670_v58  ;;  %v2754_v56 = vld [vmem:[#allocation2 + $0x50c] ss:$16 sps:$4 sm:$0xff]   ;;  %v2752_v58 = vld [vmem:[#allocation2 + $0x508] ss:$16 sps:$4 sm:$0xff]  }
  0xd1   :  { %2025 = vmatprep.subr.bf16.mxu1 %v2673_v59  ;;  %1912 = vmatprep.mubr.bf16.mxu0 %v2833_v27  ;;  %v2688_v27 = vld [vmem:[#allocation2 + $0x46c] ss:$16 sps:$4 sm:$0xff]   ;;  %v2755_v59 = vld [vmem:[#allocation2 + $0x708] ss:$16 sps:$4 sm:$0xff]  }
  0xd2   :  { %1963 = vmatprep.mubr.bf16.mxu1 %v2840_v32  ;;  %v2691_v32 = vld [vmem:[#allocation2 + $0x66c] ss:$16 sps:$4 sm:$0xff]  }
  0xd3   :  { %1975 = vmatpush1.bf16.msra.mxu0 %v2668_v60  ;;  %v2757_v57 = vld [vmem:[#allocation2 + $0x70c] ss:$16 sps:$4 sm:$0xff]  }
  0xd4   :  { %2026 = vmatpush1.bf16.msra.mxu1 %v2671_v61  ;;  %1976 = vmatprep.subr.bf16.mxu0 %v2676_v62 }
  0xd5   :  { %2027 = vmatprep.subr.bf16.mxu1 %v2679_v63 }
  0xd6   :  { %1913 = vmatmul.mubr.bf16.gmra.mxu0 %v2835_v28  ;;  %v2694_v28 = vld [vmem:[#allocation2 + $0x44c] ss:$16 sps:$4 sm:$0xff]  }
  0xd7   :  { %1964 = vmatmul.mubr.bf16.gmra.mxu1 %v2842_v33  ;;  %1977 = vmatpush1.bf16.msra.mxu0 %v2674_v0  ;;  %v2697_v33 = vld [vmem:[#allocation2 + $0x64c] ss:$16 sps:$4 sm:$0xff]  }
  0xd8   :  { %2028 = vmatpush1.bf16.msra.mxu1 %v2677_v1  ;;  %1978 = vmatprep.subr.bf16.mxu0 %v2682_v8 }
  0xd9   :  { %2029 = vmatprep.subr.bf16.mxu1 %v2685_v9  ;;  %2004 = vmatprep.mubr.bf16.mxu0 %v2860_v44  ;;  %v2698_v44 = vld [vmem:[#allocation2 + $0x428] ss:$16 sps:$4 sm:$0xff]  }
  0xda   :  { %2055 = vmatprep.mubr.bf16.mxu1 %v2874_v49  ;;  %v2701_v49 = vld [vmem:[#allocation2 + $0x628] ss:$16 sps:$4 sm:$0xff]  }
  0xdb   :  { %1979 = vmatpush1.bf16.msra.mxu0 %v2680_v2 }
  0xdc   :  { %2030 = vmatpush1.bf16.msra.mxu1 %v2683_v53  ;;  %1980 = vmatprep.subr.bf16.mxu0 %v2688_v27 }
  0xdd   :  { %2031 = vmatprep.subr.bf16.mxu1 %v2691_v32 }
  0xdf   :  { %1981 = vmatpush1.bf16.msra.mxu0 %v2686_v55  ;;  %v298_v55 = vlaneseq }
  0xe0   :  { %2032 = vmatpush1.bf16.msra.mxu1 %v2689_v3  ;;  %1982 = vmatprep.subr.bf16.mxu0 %v2694_v28 }
  0xe1   :  { %2033 = vmatprep.subr.bf16.mxu1 %v2697_v33  ;;  %v2922_v3 = vshrl.u32 %v298_v55, 7 }
  0xe3   :  { %1983 = vmatpush1.bf16.msra.mxu0 %v2692_v4  ;;  %v300_v28 = vsub.s32 0, %v2922_v3  ;;  %v312_v55 = vsub.s32 3, %v2922_v3 }
  0xe4   :  { %2034 = vmatpush1.bf16.msra.mxu1 %v2695_v5  ;;  %1984 = vmatprep.subr.bf16.mxu0 %v2700_v6 }
  0xe5   :  { %2035 = vmatprep.subr.bf16.mxu1 %v2703_v7 }
  0xe7   :  { %1985 = vmatpush1.bf16.msra.mxu0 %v2698_v44 }
  0xe8   :  { %2036 = vmatpush1.bf16.msra.mxu1 %v2701_v49  ;;  %1986 = vmatprep.subr.bf16.mxu0 %v2706_v10 }
  0xe9   :  { %2037 = vmatprep.subr.bf16.mxu1 %v2709_v11 }
  0xeb   :  { %1987 = vmatpush1.bf16.msra.mxu0 %v2704_v12 }
  0xec   :  { %2038 = vmatpush1.bf16.msra.mxu1 %v2707_v13  ;;  %1988 = vmatprep.subr.bf16.mxu0 %v2712_v14 }
  0xed   :  { %2039 = vmatprep.subr.bf16.mxu1 %v2715_v15 }
  0xef   :  { %1989 = vmatpush2.bf16.msra.mxu0 %v2710_v16 }
  0xf0   :  { %2040 = vmatpush2.bf16.msra.mxu1 %v2713_v17  ;;  %1990 = vmatprep.subr.bf16.mxu0 %v2718_v18 }
  0xf1   :  { %2041 = vmatprep.subr.bf16.mxu1 %v2721_v19 }
  0xf3   :  { %1991 = vmatpush2.bf16.msra.mxu0 %v2716_v20 }
  0xf4   :  { %2042 = vmatpush2.bf16.msra.mxu1 %v2719_v21  ;;  %1992 = vmatprep.subr.bf16.mxu0 %v2724_v22 }
  0xf5   :  { %2043 = vmatprep.subr.bf16.mxu1 %v2727_v23 }
  0xf7   :  { %1993 = vmatpush2.bf16.msra.mxu0 %v2722_v24 }
  0xf8   :  { %2044 = vmatpush2.bf16.msra.mxu1 %v2725_v25  ;;  %1994 = vmatprep.subr.bf16.mxu0 %v2730_v26 }
  0xf9   :  { %2045 = vmatprep.subr.bf16.mxu1 %v2733_v29 }
  0xfb   :  { %1995 = vmatpush2.bf16.msra.mxu0 %v2728_v34 }
  0xfc   :  { %2046 = vmatpush2.bf16.msra.mxu1 %v2731_v35  ;;  %1996 = vmatprep.subr.bf16.mxu0 %v2736_v36 }
  0xfd   :  { %2047 = vmatprep.subr.bf16.mxu1 %v2739_v37 }
  0xff   :  { %1997 = vmatpush2.bf16.msra.mxu0 %v2734_v40 }
 0x100   :  { %2048 = vmatpush2.bf16.msra.mxu1 %v2737_v41  ;;  %1998 = vmatprep.subr.bf16.mxu0 %v2742_v42 }
 0x101   :  { %2049 = vmatprep.subr.bf16.mxu1 %v2745_v43 }
 0x103   :  { %1999 = vmatpush2.bf16.msra.mxu0 %v2740_v46 }
 0x104   :  { %2050 = vmatpush2.bf16.msra.mxu1 %v2743_v47  ;;  %2000 = vmatprep.subr.bf16.mxu0 %v2748_v50 }
 0x105   :  { %2051 = vmatprep.subr.bf16.mxu1 %v2751_v51 }
 0x107   :  { %2001 = vmatpush2.bf16.msra.mxu0 %v2746_v52 }
 0x108   :  { %2052 = vmatpush2.bf16.msra.mxu1 %v2749_v54  ;;  %2002 = vmatprep.subr.bf16.mxu0 %v2754_v56 }
 0x109   :  { %2053 = vmatprep.subr.bf16.mxu1 %v2757_v57 }
 0x10b   :  { %2003 = vmatpush2.bf16.msra.mxu0 %v2752_v58 }
 0x10c   :  { %2054 = vmatpush2.bf16.msra.mxu1 %v2755_v59 }
 0x10e   :  { %2005 = vmatmul.mubr.bf16.vlgmr.msra.gmra.mxu0 %v2880_v30  ;;  %v1700_v60 = vpop.f32.mrf.mxu0 }
 0x10f   :  { %2056 = vmatmul.mubr.bf16.vlgmr.msra.gmra.mxu1 %v2884_v31  ;;  %2014 = vmatprep.mubr.bf16.mxu0 %v2892_v38  ;;  %v1751_v61 = vpop.f32.mrf.mxu1 }
 0x110   :  { %2065 = vmatprep.mubr.bf16.mxu1 %v2894_v39  ;;  %v1702_v62 = vpop.f32.mrf.mxu0 }
 0x111   :  { %v1753_v63 = vpop.f32.mrf.mxu1 }
 0x112   :  { %v1704_v0 = vpop.f32.mrf.mxu0 }
 0x113   :  { %v1755_v1 = vpop.f32.mrf.mxu1 }
 0x114   :  { %v1706_v8 = vpop.f32.mrf.mxu0 }
 0x115   :  { %v1757_v9 = vpop.f32.mrf.mxu1 }
 0x116   :  { %2015 = vmatmul.mubr.bf16.gmra.mxu0 %v2900_v45  ;;  %v1710_v2 = vpop.f32.mrf.mxu0  ;;  %v2928_v45 = vld [vmem:[%s2975_s2] sm:$0xf] }
 0x117   :  { %2066 = vmatmul.mubr.bf16.gmra.mxu1 %v2902_v48  ;;  %v1761_v30 = vpop.f32.mrf.mxu1  ;;  %v304_v48 = vsub.s32 1, %v2922_v3  ;;  %v301_v33 = vrot.slane %v2928_v45, %v300_v28 }
 0x118   :  { %v1712_v53 = vpop.f32.mrf.mxu0 }
 0x119   :  { %v1763_v31 = vpop.f32.mrf.mxu1  ;;  %v305_v4 = vrot.slane %v2928_v45, %v304_v48  ;;  %v1701_v5 = vadd.f32 %v1700_v60, %v301_v33  ;;  %v1705_v44 = vadd.f32 %v1704_v0, %v301_v33  ;;  %v1711_v17 = vadd.f32 %v1710_v2, %v301_v33 }
 0x11a   :  { %v1714_v27 = vpop.f32.mrf.mxu0  ;;  %v313_v48 = vrot.slane %v2928_v45, %v312_v55 }
 0x11b   :  { %v1765_v38 = vpop.f32.mrf.mxu1  ;;  %v1703_v6 = vadd.f32 %v1702_v62, %v305_v4  ;;  %v1752_v7 = vadd.f32 %v1751_v61, %v1701_v5  ;;  %v1707_v12 = vadd.f32 %v1706_v8, %v305_v4  ;;  %v1756_v16 = vadd.f32 %v1755_v1, %v1705_v44 }
 0x11c   :  { %v1715_v32 = vpop.f32.mrf.mxu0  ;;  %v1713_v23 = vadd.f32 %v1712_v53, %v305_v4  ;;  %v1762_v34 = vadd.f32 %v1761_v30, %v1711_v17 }
 0x11d   :  { %v1766_v39 = vpop.f32.mrf.mxu1  ;;  %v1754_v11 = vadd.f32 %v1753_v63, %v1703_v6  ;;  %v1758_v22 = vadd.f32 %v1757_v9, %v1707_v12 }
 0x11e   :  { %v1764_v41 = vadd.f32 %v1763_v31, %v1713_v23  ;;  %v308_v39 = vsub.s32 2, %v2922_v3 }
 0x120   :  { %v309_v28 = vrot.slane %v2928_v45, %v308_v39 }
 0x14e   :  { %v1802_v49 = vpop.f32.mrf.mxu0 }
 0x14f   :  { %v1853_v10 = vpop.f32.mrf.mxu1  ;;  %v1803_v13 = vadd.f32 %v1802_v49, %v1752_v7 }
 0x150   :  { %v1804_v14 = vpop.f32.mrf.mxu0 }
 0x151   :  { %v1855_v15 = vpop.f32.mrf.mxu1  ;;  %v1854_v18 = vadd.f32 %v1853_v10, %v1803_v13  ;;  %v1805_v19 = vadd.f32 %v1804_v14, %v1754_v11 }
 0x152   :  { %v1806_v20 = vpop.f32.mrf.mxu0 }
 0x153   :  { %v1857_v21 = vpop.f32.mrf.mxu1  ;;  %2074 = vst [vmem:[%s2976_s3] sm:$0xff] %v1854_v18  ;;  %v1856_v24 = vadd.f32 %v1855_v15, %v1805_v19  ;;  %v1807_v25 = vadd.f32 %v1806_v20, %v1756_v16 }
 0x154   :  { %v1808_v26 = vpop.f32.mrf.mxu0 }
 0x155   :  { %v1859_v29 = vpop.f32.mrf.mxu1  ;;  %2075 = vst [vmem:[%s2976_s3 + $0x8] sm:$0xff] %v1856_v24  ;;  %v1858_v35 = vadd.f32 %v1857_v21, %v1807_v25  ;;  %v1809_v36 = vadd.f32 %v1808_v26, %v1758_v22 }
 0x156   :  { %v1812_v37 = vpop.f32.mrf.mxu0 }
 0x157   :  { %v1863_v40 = vpop.f32.mrf.mxu1  ;;  %2078 = vst [vmem:[%s2976_s3 + $0x20] sm:$0xff] %v1858_v35  ;;  %v1860_v42 = vadd.f32 %v1859_v29, %v1809_v36  ;;  %v1813_v43 = vadd.f32 %v1812_v37, %v1762_v34 }
 0x158   :  { %v1814_v46 = vpop.f32.mrf.mxu0 }
 0x159   :  { %v1865_v47 = vpop.f32.mrf.mxu1  ;;  %2079 = vst [vmem:[%s2976_s3 + $0x28] sm:$0xff] %v1860_v42  ;;  %v1815_v50 = vadd.f32 %v1814_v46, %v1764_v41  ;;  %v1864_v51 = vadd.f32 %v1863_v40, %v1813_v43 }
 0x15a   :  { %v1816_v52 = vpop.f32.mrf.mxu0 }
 0x15b   :  { %v1867_v54 = vpop.f32.mrf.mxu1  ;;  %2082 = vst [vmem:[%s2976_s3 + $0x40] sm:$0xff] %v1864_v51  ;;  %v1866_v56 = vadd.f32 %v1865_v47, %v1815_v50 }
 0x15c   :  { %v1817_v57 = vpop.f32.mrf.mxu0 }
 0x15d   :  { %v1868_v58 = vpop.f32.mrf.mxu1  ;;  %2083 = vst [vmem:[%s2976_s3 + $0x48] sm:$0xff] %v1866_v56 }
 0x18e   :  { %v1904_v59 = vpop.f32.mrf.mxu0 }
 0x18f   :  { %v1955_v60 = vpop.f32.mrf.mxu1  ;;  %v1905_v33 = vadd.f32 %v1904_v59, %v309_v28 }
 0x190   :  { %v1906_v61 = vpop.f32.mrf.mxu0 }
 0x191   :  { %v1957_v62 = vpop.f32.mrf.mxu1  ;;  %v1907_v4 = vadd.f32 %v1906_v61, %v313_v48  ;;  %v1956_v5 = vadd.f32 %v1955_v60, %v1905_v33 }
 0x192   :  { %v1908_v63 = vpop.f32.mrf.mxu0 }
 0x193   :  { %v1959_v0 = vpop.f32.mrf.mxu1  ;;  %v1909_v6 = vadd.f32 %v1908_v63, %v309_v28  ;;  %v1958_v49 = vadd.f32 %v1957_v62, %v1907_v4 }
 0x194   :  { %v1910_v1 = vpop.f32.mrf.mxu0 }
 0x195   :  { %v1961_v8 = vpop.f32.mrf.mxu1  ;;  %v1911_v10 = vadd.f32 %v1910_v1, %v313_v48  ;;  %v1960_v14 = vadd.f32 %v1959_v0, %v1909_v6 }
 0x196   :  { %v1914_v9 = vpop.f32.mrf.mxu0 }
 0x197   :  { %v1965_v2 = vpop.f32.mrf.mxu1  ;;  %v1915_v15 = vadd.f32 %v1914_v9, %v309_v28  ;;  %v1962_v19 = vadd.f32 %v1961_v8, %v1911_v10 }
 0x198   :  { %v1916_v30 = vpop.f32.mrf.mxu0 }
 0x199   :  { %v1967_v53 = vpop.f32.mrf.mxu1  ;;  %v1917_v20 = vadd.f32 %v1916_v30, %v313_v48  ;;  %v1966_v24 = vadd.f32 %v1965_v2, %v1915_v15 }
 0x19a   :  { %v1918_v31 = vpop.f32.mrf.mxu0 }
 0x19b   :  { %v1969_v27 = vpop.f32.mrf.mxu1  ;;  %v1968_v35 = vadd.f32 %v1967_v53, %v1917_v20 }
 0x19c   :  { %v1919_v38 = vpop.f32.mrf.mxu0 }
 0x19d   :  { %v1970_v32 = vpop.f32.mrf.mxu1 }
 0x1ce   :  { %v2006_v7 = vpop.f32.mrf.mxu0 }
 0x1cf   :  { %v2057_v44 = vpop.f32.mrf.mxu1  ;;  %v2007_v11 = vadd.f32 %v2006_v7, %v1956_v5 }
 0x1d0   :  { %v2008_v12 = vpop.f32.mrf.mxu0 }
 0x1d1   :  { %v2059_v13 = vpop.f32.mrf.mxu1  ;;  %v2058_v16 = vadd.f32 %v2057_v44, %v2007_v11  ;;  %v2009_v17 = vadd.f32 %v2008_v12, %v1958_v49 }
 0x1d2   :  { %v2010_v3 = vpop.f32.mrf.mxu0 }
 0x1d3   :  { %v2061_v18 = vpop.f32.mrf.mxu1  ;;  %2076 = vst [vmem:[%s2976_s3 + $0x10] sm:$0xff] %v2058_v16  ;;  %v2060_v45 = vadd.f32 %v2059_v13, %v2009_v17  ;;  %v2011_v21 = vadd.f32 %v2010_v3, %v1960_v14 }
 0x1d4   :  { %v2012_v22 = vpop.f32.mrf.mxu0 }
 0x1d5   :  { %v2063_v23 = vpop.f32.mrf.mxu1  ;;  %2077 = vst [vmem:[%s2976_s3 + $0x18] sm:$0xff] %v2060_v45  ;;  %v2062_v25 = vadd.f32 %v2061_v18, %v2011_v21  ;;  %v2013_v26 = vadd.f32 %v2012_v22, %v1962_v19 }
 0x1d6   :  { %v2016_v29 = vpop.f32.mrf.mxu0 }
 0x1d7   :  { %v2067_v34 = vpop.f32.mrf.mxu1  ;;  %2080 = vst [vmem:[%s2976_s3 + $0x30] sm:$0xff] %v2062_v25  ;;  %v2064_v36 = vadd.f32 %v2063_v23, %v2013_v26  ;;  %v2017_v37 = vadd.f32 %v2016_v29, %v1966_v24 }
 0x1d8   :  { %v2018_v40 = vpop.f32.mrf.mxu0 }
 0x1d9   :  { %v2069_v41 = vpop.f32.mrf.mxu1  ;;  %2081 = vst [vmem:[%s2976_s3 + $0x38] sm:$0xff] %v2064_v36  ;;  %v2068_v42 = vadd.f32 %v2067_v34, %v2017_v37  ;;  %v2019_v43 = vadd.f32 %v2018_v40, %v1968_v35 }
 0x1da   :  { %v2020_v46 = vpop.f32.mrf.mxu0 }
 0x1db   :  { %v2071_v47 = vpop.f32.mrf.mxu1  ;;  %2084 = vst [vmem:[%s2976_s3 + $0x50] sm:$0xff] %v2068_v42  ;;  %v2070_v50 = vadd.f32 %v2069_v41, %v2019_v43 }
 0x1dc   :  { %v2021_v51 = vpop.f32.mrf.mxu0 }
 0x1dd   :  { %v2072_v52 = vpop.f32.mrf.mxu1  ;;  %2085 = vst [vmem:[%s2976_s3 + $0x58] sm:$0xff] %v2070_v50 }
 0x1de   :  { %2090 = vsyncpa [#allocation3], 1 }

</bundles_post_ra>
